<compile_context>
chip_gen: v5e
topology: v5e:2x2
jax: 0.10.0
libtpu: 0.0.40
codegen_flags: <defaults>
</compile_context>

<pallas_src>
import functools
import math

import jax
import jax.numpy as jnp
from jax.experimental import pallas as pl
from jax.experimental.pallas import tpu as pltpu

# --- small synthetic stand-in config for 'skt/kobert-base-v1' ---------------
VOCAB = 100
HIDDEN = 32
NUM_HEADS = 4
HEAD_DIM = HIDDEN // NUM_HEADS
NUM_LAYERS = 2
INTERMEDIATE = 64
MAX_POS = 16
TYPE_VOCAB = 2
LN_EPS = 1e-12

TOWER_INDEX = {"passage": 0, "query": 1}

PARAM_ORDER = (
    "emb_ln_g", "emb_ln_b",
    "w_qkv", "b_qkv", "w_o", "b_o", "ln1_g", "ln1_b",
    "w_i", "b_i", "w_out", "b_out", "ln2_g", "ln2_b",
    "pool_w", "pool_b",
)

_L, _H, _I = NUM_LAYERS, HIDDEN, INTERMEDIATE
PARAM_INNER_SHAPES = {
    "emb_ln_g": (1, _H), "emb_ln_b": (1, _H),
    "w_qkv": (_L, _H, 3 * _H), "b_qkv": (_L, 1, 3 * _H),
    "w_o": (_L, _H, _H), "b_o": (_L, 1, _H),
    "ln1_g": (_L, 1, _H), "ln1_b": (_L, 1, _H),
    "w_i": (_L, _H, _I), "b_i": (_L, 1, _I),
    "w_out": (_L, _I, _H), "b_out": (_L, 1, _H),
    "ln2_g": (_L, 1, _H), "ln2_b": (_L, 1, _H),
    "pool_w": (_H, _H), "pool_b": (1, _H),
}


# --------------------------- in-kernel helpers -------------------------------
def _bf16(x):
    # Weights are already bf16 on the host (no in-kernel cast); activations are
    # cast to bf16 for MXU throughput, accumulation stays f32.
    return x if x.dtype == jnp.bfloat16 else x.astype(jnp.bfloat16)


def _dot(a, b):
    return jnp.dot(_bf16(a), _bf16(b), preferred_element_type=jnp.float32)


def _dot_nt(a, b):
    # a: (M, D), b: (N, D) -> (M, N), contracting the trailing dim of both
    # (same contraction pattern as the canonical flash-attention q@k^T).
    return jax.lax.dot_general(
        _bf16(a), _bf16(b),
        dimension_numbers=(((1,), (1,)), ((), ())),
        preferred_element_type=jnp.float32)


def _ln(x, g, b):
    mean = jnp.mean(x, axis=-1, keepdims=True)
    var = jnp.mean(jnp.square(x - mean), axis=-1, keepdims=True)
    inv = jax.lax.rsqrt(var + LN_EPS)
    return (x - mean) * inv * g + b


def _gelu(y):
    # TODO(synk): HF BERT uses erf GELU; tanh approximation used here.
    c = math.sqrt(2.0 / math.pi)
    return 0.5 * y * (1.0 + jnp.tanh(c * (y + 0.044715 * y * y * y)))


# --------------------------- fused tower kernel ------------------------------
def _tower_kernel_factory(B, S):
    BS = B * S
    scale = 1.0 / math.sqrt(HEAD_DIM)

    def kernel(emb_ref, bias_ref,
               emb_ln_g, emb_ln_b,
               w_qkv, b_qkv, w_o, b_o, ln1_g, ln1_b,
               w_i, b_i, w_out, b_out, ln2_g, ln2_b,
               pool_w, pool_b,
               o_ref):
        # Additive attention bias (0 keep / -1e9 masked or cross-batch), shared
        # across heads, layers and towers.  Kept in f32.
        bias = bias_ref[...]                                         # (BS, BS)

        # Embedding LayerNorm.
        h = _ln(emb_ref[...], emb_ln_g[...], emb_ln_b[...])          # (BS, H) f32

        # TODO(synk): at real depth (L=12) switch to lax.fori_loop over the
        #             stacked layer axis to bound code size / vreg live ranges.
        for l in range(NUM_LAYERS):
            # --- self-attention: fused QKV projection (single N=96 matmul) ---
            qkv = _dot(h, w_qkv[l]) + b_qkv[l]                       # (BS, 3H) f32

            # Per-head attention on flattened 2-D tiles.  Batch separation and
            # key padding come from `bias`, so there are no (B,S,...) reshapes,
            # no 3-D einsums and no lane-axis concat; the head-context concat
            # is folded into per-head row slices of W_o (zero-cost ref slices).
            attn = jnp.zeros((BS, HIDDEN), jnp.float32)
            for hh in range(NUM_HEADS):
                lo = hh * HEAD_DIM
                qh = qkv[:, lo:lo + HEAD_DIM]                          # (BS, HD)
                kh = qkv[:, HIDDEN + lo:HIDDEN + lo + HEAD_DIM]        # (BS, HD)
                vh = qkv[:, 2 * HIDDEN + lo:2 * HIDDEN + lo + HEAD_DIM]

                s = _dot_nt(qh, kh) * scale + bias                     # (BS, BS)
                s = s - jnp.max(s, axis=-1, keepdims=True)             # stable softmax
                p = jnp.exp(s)
                p = p * pl.reciprocal(jnp.sum(p, axis=-1, keepdims=True),
                                      approx=True)
                ctx = _dot(p, vh)                                      # (BS, HD)
                attn = attn + _dot(ctx, w_o[l, lo:lo + HEAD_DIM, :])   # (BS, H)

            # --- fused residual + LN ---
            h = _ln(h + attn + b_o[l], ln1_g[l], ln1_b[l])

            # --- feed-forward + fused residual + LN ---
            ff = _gelu(_dot(h, w_i[l]) + b_i[l])
            ff = _dot(ff, w_out[l]) + b_out[l]
            h = _ln(h + ff, ln2_g[l], ln2_b[l])

        # --- pooler (fused): dense(tanh) over the [CLS] token ---
        cls = h.reshape(B, S, HIDDEN)[:, 0:1, :].reshape(B, HIDDEN)
        o_ref[...] = jnp.tanh(_dot(cls, pool_w[...]) + pool_b[...]).astype(o_ref.dtype)

    return kernel


def _tower_cost(T, B, S):
    L, H, I, NH, HD = NUM_LAYERS, HIDDEN, INTERMEDIATE, NUM_HEADS, HEAD_DIM
    BS = B * S
    mm = 2 * BS * H * 3 * H + 2 * BS * H * H + 2 * BS * H * I + 2 * BS * I * H
    attn = NH * (2 * BS * BS * HD + 2 * BS * BS * HD)
    flops = T * (L * (mm + attn) + 2 * B * H * H)
    trans = T * (L * (NH * BS * BS + BS * I) + B * H)
    w_bytes = 2 * (L * (H * 3 * H + H * H + H * I + I * H) + H * H)     # bf16 weights
    other = 4 * (BS * H + BS * BS + B * H
                 + L * (3 * H + H + I + H + 8 * H) + 2 * H + H)
    return pl.CostEstimate(flops=int(flops), transcendentals=int(trans),
                           bytes_accessed=int(T * (w_bytes + other)))


def _tower_block_spec(stacked_shape):
    # Leading tower dim squeezed out per grid step; remaining dims full-extent.
    inner = tuple(stacked_shape[1:])
    nd = len(stacked_shape)
    return pl.BlockSpec((None,) + inner, lambda t, _nd=nd: (t,) + (0,) * (_nd - 1))


@functools.lru_cache(maxsize=None)
def _make_tower_call(T, B, S):
    BS = B * S
    in_specs = [
        _tower_block_spec((T, BS, HIDDEN)),                 # embeddings
        pl.BlockSpec((BS, BS), lambda t: (0, 0)),           # shared attention bias
    ] + [_tower_block_spec((T,) + PARAM_INNER_SHAPES[k]) for k in PARAM_ORDER]

    return pl.pallas_call(
        _tower_kernel_factory(B, S),
        grid=(T,),
        in_specs=in_specs,
        out_specs=pl.BlockSpec((None, B, HIDDEN), lambda t: (t, 0, 0)),
        out_shape=jax.ShapeDtypeStruct((T, B, HIDDEN), jnp.float32),
        compiler_params=pltpu.CompilerParams(dimension_semantics=("parallel",)),
        cost_estimate=_tower_cost(T, B, S),
    )


# --------------------------- parameter init ---------------------------------
def init_bert_params(key):
    ks = iter(jax.random.split(key, 16))

    def dense(*shape):
        return 0.02 * jax.random.normal(next(ks), shape, jnp.float32)

    def dense_bf16(*shape):
        # Matmul weights pre-cast to bf16 on the host (halves weight DMA).
        return dense(*shape).astype(jnp.bfloat16)

    L, H, I = NUM_LAYERS, HIDDEN, INTERMEDIATE
    return {
        "word_emb": dense(VOCAB, H),
        "pos_emb": dense(MAX_POS, H),
        "type_emb": dense(TYPE_VOCAB, H),
        "emb_ln_g": jnp.ones((1, H), jnp.float32),
        "emb_ln_b": jnp.zeros((1, H), jnp.float32),
        "w_qkv": dense_bf16(L, H, 3 * H),
        "b_qkv": jnp.zeros((L, 1, 3 * H), jnp.float32),
        "w_o": dense_bf16(L, H, H),
        "b_o": jnp.zeros((L, 1, H), jnp.float32),
        "ln1_g": jnp.ones((L, 1, H), jnp.float32),
        "ln1_b": jnp.zeros((L, 1, H), jnp.float32),
        "w_i": dense_bf16(L, H, I),
        "b_i": jnp.zeros((L, 1, I), jnp.float32),
        "w_out": dense_bf16(L, I, H),
        "b_out": jnp.zeros((L, 1, H), jnp.float32),
        "ln2_g": jnp.ones((L, 1, H), jnp.float32),
        "ln2_b": jnp.zeros((L, 1, H), jnp.float32),
        "pool_w": dense_bf16(H, H),
        "pool_b": jnp.zeros((1, H), jnp.float32),
    }


def init_retriever_params(key):
    # Both towers stacked on a leading tower axis: [0]=passage, [1]=query.
    k_pass, k_query = jax.random.split(key)
    towers = [init_bert_params(k_pass), init_bert_params(k_query)]
    return {name: jnp.stack([t[name] for t in towers]) for name in towers[0]}


# --------------------------- forward (glue + fused kernel) -------------------
def _attn_bias(att_mask):
    # (B,S) 0/1 key mask -> flattened (BS,BS) additive bias: 0 where query i may
    # attend key j (same batch, key not padded), -1e9 otherwise.
    B, S = att_mask.shape
    BS = B * S
    key_keep = att_mask.astype(jnp.float32).reshape(BS)
    batch_id = jnp.arange(BS, dtype=jnp.int32) // S
    same = (batch_id[:, None] == batch_id[None, :]).astype(jnp.float32)
    keep = same * key_keep[None, :]
    return (keep - 1.0) * 1e9


def _encode_stacked(params, input_ids, att_mask):
    T = params["word_emb"].shape[0]
    B, S = input_ids.shape
    # Embedding lookups stay in JAX glue (data-dependent gather); everything
    # downstream runs inside one fused Pallas kernel (grid over towers).
    # TODO(synk): positional table caps at MAX_POS; S must be <= MAX_POS.
    emb = (params["word_emb"][:, input_ids]                      # (T, B, S, H)
           + params["pos_emb"][:, :S][:, None, :, :]             # (T, 1, S, H)
           + params["type_emb"][:, 0][:, None, None, :])         # token_type_ids == 0
    emb = emb.reshape(T, B * S, HIDDEN).astype(jnp.float32)
    bias = _attn_bias(att_mask)
    tower_call = _make_tower_call(T, B, S)
    return tower_call(emb, bias, *[params[k] for k in PARAM_ORDER])  # (T, B, H)


@jax.jit
def retriever_encoder_forward_both(params, input_ids, att_mask):
    # Fused path: both towers in ONE pallas_call (grid=(2,), "parallel" -> one
    # tower per TensorCore on v7x; single launch everywhere).
    return _encode_stacked(params, input_ids, att_mask)


@functools.partial(jax.jit, static_argnames="tower_idx")
def _encode_single_tower(params, input_ids, att_mask, tower_idx):
    single = jax.tree_util.tree_map(lambda x: x[tower_idx:tower_idx + 1], params)
    return _encode_stacked(single, input_ids, att_mask)[0]


def retriever_encoder_forward(params, input_ids, att_mask, type):
    # Original module semantics: return pooler_output of the selected tower.
    idx = TOWER_INDEX["passage"] if type == "passage" else TOWER_INDEX["query"]
    return _encode_single_tower(params, input_ids, att_mask, idx)


# --------------------------- main --------------------------------------------
if __name__ == "__main__":
    root = jax.random.PRNGKey(0)
    k_params, k_ids = jax.random.split(root)

    params = init_retriever_params(k_params)

    B, S = 2, 8
    input_ids = jax.random.randint(k_ids, (B, S), 0, VOCAB, dtype=jnp.int32)
    att_mask = jnp.ones((B, S), jnp.int32).at[1, 6:].set(0)   # second seq has padding

    # Fused dual-tower launch (both towers, one pallas_call).
    both = retriever_encoder_forward_both(params, input_ids, att_mask)

    # Original per-type API (single-tower grid), must match the fused result.
    out_passage = retriever_encoder_forward(params, input_ids, att_mask, "passage")
    out_query = retriever_encoder_forward(params, input_ids, att_mask, "query")
    jax.block_until_ready((both, out_passage, out_query))

    assert both.shape == (2, B, HIDDEN) and both.dtype == jnp.float32
    assert out_passage.shape == (B, HIDDEN) and out_passage.dtype == jnp.float32
    assert out_query.shape == (B, HIDDEN) and out_query.dtype == jnp.float32
    assert bool(jnp.all(jnp.isfinite(both)))
    assert bool(jnp.all(jnp.isfinite(out_passage))) and bool(jnp.all(jnp.isfinite(out_query)))
    assert bool(jnp.allclose(both[0], out_passage, atol=1e-5, rtol=1e-5))
    assert bool(jnp.allclose(both[1], out_query, atol=1e-5, rtol=1e-5))
    print("KERNEL_OK")
</pallas_src>

<mosaic_0001>
module attributes {stable_mosaic.version = 11 : i64} {
  func.func @kernel(%arg0: i32, %arg1: memref<1x16x32xf32, #tpu.memory_space<vmem>>, %arg2: memref<16x16xf32, #tpu.memory_space<vmem>>, %arg3: memref<1x1x32xf32, #tpu.memory_space<vmem>>, %arg4: memref<1x1x32xf32, #tpu.memory_space<vmem>>, %arg5: memref<1x2x32x96xbf16, #tpu.memory_space<vmem>>, %arg6: memref<1x2x1x96xf32, #tpu.memory_space<vmem>>, %arg7: memref<1x2x32x32xbf16, #tpu.memory_space<vmem>>, %arg8: memref<1x2x1x32xf32, #tpu.memory_space<vmem>>, %arg9: memref<1x2x1x32xf32, #tpu.memory_space<vmem>>, %arg10: memref<1x2x1x32xf32, #tpu.memory_space<vmem>>, %arg11: memref<1x2x32x64xbf16, #tpu.memory_space<vmem>>, %arg12: memref<1x2x1x64xf32, #tpu.memory_space<vmem>>, %arg13: memref<1x2x64x32xbf16, #tpu.memory_space<vmem>>, %arg14: memref<1x2x1x32xf32, #tpu.memory_space<vmem>>, %arg15: memref<1x2x1x32xf32, #tpu.memory_space<vmem>>, %arg16: memref<1x2x1x32xf32, #tpu.memory_space<vmem>>, %arg17: memref<1x32x32xbf16, #tpu.memory_space<vmem>>, %arg18: memref<1x1x32xf32, #tpu.memory_space<vmem>>, %arg19: memref<1x2x32xf32, #tpu.memory_space<vmem>>) attributes {dimension_semantics = [#tpu.dimension_semantics<parallel>], iteration_bounds = array<i64: 2>, scalar_prefetch = 0 : i64, scratch_operands = 0 : i64, tpu.core_type = #tpu.core_type<tc>, window_params = [{transform_indices = @transform_0, window_bounds = array<i64: 1, 16, 32>}, {pipeline_mode = #tpu.pipeline_mode<synchronous>, transform_indices = @transform_1, window_bounds = array<i64: 16, 16>}, {transform_indices = @transform_2, window_bounds = array<i64: 1, 1, 32>}, {transform_indices = @transform_3, window_bounds = array<i64: 1, 1, 32>}, {transform_indices = @transform_4, window_bounds = array<i64: 1, 2, 32, 96>}, {transform_indices = @transform_5, window_bounds = array<i64: 1, 2, 1, 96>}, {transform_indices = @transform_6, window_bounds = array<i64: 1, 2, 32, 32>}, {transform_indices = @transform_7, window_bounds = array<i64: 1, 2, 1, 32>}, {transform_indices = @transform_8, window_bounds = array<i64: 1, 2, 1, 32>}, {transform_indices = @transform_9, window_bounds = array<i64: 1, 2, 1, 32>}, {transform_indices = @transform_10, window_bounds = array<i64: 1, 2, 32, 64>}, {transform_indices = @transform_11, window_bounds = array<i64: 1, 2, 1, 64>}, {transform_indices = @transform_12, window_bounds = array<i64: 1, 2, 64, 32>}, {transform_indices = @transform_13, window_bounds = array<i64: 1, 2, 1, 32>}, {transform_indices = @transform_14, window_bounds = array<i64: 1, 2, 1, 32>}, {transform_indices = @transform_15, window_bounds = array<i64: 1, 2, 1, 32>}, {transform_indices = @transform_16, window_bounds = array<i64: 1, 32, 32>}, {transform_indices = @transform_17, window_bounds = array<i64: 1, 1, 32>}, {transform_indices = @transform_18, window_bounds = array<i64: 1, 2, 32>}]} {
    %c0 = arith.constant 0 : index
    %c0_0 = arith.constant 0 : index
    %0 = vector.load %arg2[%c0, %c0_0] : memref<16x16xf32, #tpu.memory_space<vmem>>, vector<16x16xf32>
    %c0_1 = arith.constant 0 : index
    %c0_2 = arith.constant 0 : index
    %c0_3 = arith.constant 0 : index
    %1 = vector.load %arg1[%c0_1, %c0_2, %c0_3] : memref<1x16x32xf32, #tpu.memory_space<vmem>>, vector<1x16x32xf32>
    %2 = vector.shape_cast %1 : vector<1x16x32xf32> to vector<16x32xf32>
    %c0_4 = arith.constant 0 : index
    %c0_5 = arith.constant 0 : index
    %c0_6 = arith.constant 0 : index
    %3 = vector.load %arg3[%c0_4, %c0_5, %c0_6] : memref<1x1x32xf32, #tpu.memory_space<vmem>>, vector<1x1x32xf32>
    %4 = vector.shape_cast %3 : vector<1x1x32xf32> to vector<1x32xf32>
    %c0_7 = arith.constant 0 : index
    %c0_8 = arith.constant 0 : index
    %c0_9 = arith.constant 0 : index
    %5 = vector.load %arg4[%c0_7, %c0_8, %c0_9] : memref<1x1x32xf32, #tpu.memory_space<vmem>>, vector<1x1x32xf32>
    %6 = vector.shape_cast %5 : vector<1x1x32xf32> to vector<1x32xf32>
    %cst = arith.constant dense<0.000000e+00> : vector<16xf32>
    %7 = vector.multi_reduction <add>, %2, %cst [1] : vector<16x32xf32> to vector<16xf32>
    %8 = vector.shape_cast %7 : vector<16xf32> to vector<16x1xf32>
    %cst_10 = arith.constant 3.200000e+01 : f32
    %9 = vector.broadcast %cst_10 : f32 to vector<16x1xf32>
    %10 = arith.divf %8, %9 : vector<16x1xf32>
    %11 = vector.broadcast %10 : vector<16x1xf32> to vector<16x32xf32>
    %12 = arith.subf %2, %11 : vector<16x32xf32>
    %13 = arith.mulf %12, %12 : vector<16x32xf32>
    %cst_11 = arith.constant dense<0.000000e+00> : vector<16xf32>
    %14 = vector.multi_reduction <add>, %13, %cst_11 [1] : vector<16x32xf32> to vector<16xf32>
    %15 = vector.shape_cast %14 : vector<16xf32> to vector<16x1xf32>
    %cst_12 = arith.constant 3.200000e+01 : f32
    %16 = vector.broadcast %cst_12 : f32 to vector<16x1xf32>
    %17 = arith.divf %15, %16 : vector<16x1xf32>
    %cst_13 = arith.constant 9.99999996E-13 : f32
    %18 = vector.broadcast %cst_13 : f32 to vector<16x1xf32>
    %19 = arith.addf %17, %18 : vector<16x1xf32>
    %20 = math.rsqrt %19 : vector<16x1xf32>
    %21 = vector.broadcast %10 : vector<16x1xf32> to vector<16x32xf32>
    %22 = arith.subf %2, %21 : vector<16x32xf32>
    %23 = vector.broadcast %20 : vector<16x1xf32> to vector<16x32xf32>
    %24 = arith.mulf %22, %23 : vector<16x32xf32>
    %25 = vector.broadcast %4 : vector<1x32xf32> to vector<16x32xf32>
    %26 = arith.mulf %24, %25 : vector<16x32xf32>
    %27 = vector.broadcast %6 : vector<1x32xf32> to vector<16x32xf32>
    %28 = arith.addf %26, %27 : vector<16x32xf32>
    %c0_14 = arith.constant 0 : index
    %c0_15 = arith.constant 0 : index
    %c0_16 = arith.constant 0 : index
    %c0_17 = arith.constant 0 : index
    %29 = vector.load %arg5[%c0_14, %c0_15, %c0_16, %c0_17] : memref<1x2x32x96xbf16, #tpu.memory_space<vmem>>, vector<1x1x32x96xbf16>
    %30 = vector.shape_cast %29 : vector<1x1x32x96xbf16> to vector<32x96xbf16>
    %31 = arith.truncf %28 : vector<16x32xf32> to vector<16x32xbf16>
    %cst_18 = arith.constant dense<0.000000e+00> : vector<16x96xf32>
    %32 = tpu.matmul %31, %30, %cst_18 {dimension_numbers = #tpu.dot_dimension_numbers<[1], [0], [0], [1], [0, 0, 1, 1], [], []>} : vector<16x32xbf16>, vector<32x96xbf16>, vector<16x96xf32> -> vector<16x96xf32>
    %c0_19 = arith.constant 0 : index
    %c0_20 = arith.constant 0 : index
    %c0_21 = arith.constant 0 : index
    %c0_22 = arith.constant 0 : index
    %33 = vector.load %arg6[%c0_19, %c0_20, %c0_21, %c0_22] : memref<1x2x1x96xf32, #tpu.memory_space<vmem>>, vector<1x1x1x96xf32>
    %34 = vector.shape_cast %33 : vector<1x1x1x96xf32> to vector<1x96xf32>
    %35 = vector.broadcast %34 : vector<1x96xf32> to vector<16x96xf32>
    %36 = arith.addf %32, %35 : vector<16x96xf32>
    %cst_23 = arith.constant 0.000000e+00 : f32
    %37 = vector.broadcast %cst_23 : f32 to vector<16x32xf32>
    %38 = vector.extract_strided_slice %36 {offsets = [0, 0], sizes = [16, 8], strides = [1, 1]} : vector<16x96xf32> to vector<16x8xf32>
    %39 = vector.extract_strided_slice %36 {offsets = [0, 32], sizes = [16, 8], strides = [1, 1]} : vector<16x96xf32> to vector<16x8xf32>
    %40 = vector.extract_strided_slice %36 {offsets = [0, 64], sizes = [16, 8], strides = [1, 1]} : vector<16x96xf32> to vector<16x8xf32>
    %41 = arith.truncf %38 : vector<16x8xf32> to vector<16x8xbf16>
    %42 = arith.truncf %39 : vector<16x8xf32> to vector<16x8xbf16>
    %cst_24 = arith.constant dense<0.000000e+00> : vector<16x16xf32>
    %43 = tpu.matmul %41, %42, %cst_24 {dimension_numbers = #tpu.dot_dimension_numbers<[1], [1], [0], [0], [0, 0, 1, 0], [], []>} : vector<16x8xbf16>, vector<16x8xbf16>, vector<16x16xf32> -> vector<16x16xf32>
    %cst_25 = arith.constant 0.353553385 : f32
    %44 = vector.broadcast %cst_25 : f32 to vector<16x16xf32>
    %45 = arith.mulf %43, %44 : vector<16x16xf32>
    %46 = arith.addf %45, %0 : vector<16x16xf32>
    %cst_26 = arith.constant dense<0xFF800000> : vector<16xf32>
    %47 = vector.multi_reduction <maximumf>, %46, %cst_26 [1] : vector<16x16xf32> to vector<16xf32>
    %48 = vector.shape_cast %47 : vector<16xf32> to vector<16x1xf32>
    %49 = vector.broadcast %48 : vector<16x1xf32> to vector<16x16xf32>
    %50 = arith.subf %46, %49 : vector<16x16xf32>
    %51 = math.exp %50 : vector<16x16xf32>
    %cst_27 = arith.constant dense<0.000000e+00> : vector<16xf32>
    %52 = vector.multi_reduction <add>, %51, %cst_27 [1] : vector<16x16xf32> to vector<16xf32>
    %53 = vector.shape_cast %52 : vector<16xf32> to vector<16x1xf32>
    %54 = tpu.reciprocal %53 {approx = true} : vector<16x1xf32> -> vector<16x1xf32>
    %55 = vector.broadcast %54 : vector<16x1xf32> to vector<16x16xf32>
    %56 = arith.mulf %51, %55 : vector<16x16xf32>
    %57 = arith.truncf %56 : vector<16x16xf32> to vector<16x16xbf16>
    %58 = arith.truncf %40 : vector<16x8xf32> to vector<16x8xbf16>
    %cst_28 = arith.constant dense<0.000000e+00> : vector<16x8xf32>
    %59 = tpu.matmul %57, %58, %cst_28 {dimension_numbers = #tpu.dot_dimension_numbers<[1], [0], [0], [1], [0, 0, 1, 1], [], []>} : vector<16x16xbf16>, vector<16x8xbf16>, vector<16x8xf32> -> vector<16x8xf32>
    %c0_29 = arith.constant 0 : index
    %c0_30 = arith.constant 0 : index
    %c0_31 = arith.constant 0 : index
    %c0_32 = arith.constant 0 : index
    %60 = vector.load %arg7[%c0_29, %c0_30, %c0_31, %c0_32] : memref<1x2x32x32xbf16, #tpu.memory_space<vmem>>, vector<1x1x8x32xbf16>
    %61 = vector.shape_cast %60 : vector<1x1x8x32xbf16> to vector<8x32xbf16>
    %62 = arith.truncf %59 : vector<16x8xf32> to vector<16x8xbf16>
    %cst_33 = arith.constant dense<0.000000e+00> : vector<16x32xf32>
    %63 = tpu.matmul %62, %61, %cst_33 {dimension_numbers = #tpu.dot_dimension_numbers<[1], [0], [0], [1], [0, 0, 1, 1], [], []>} : vector<16x8xbf16>, vector<8x32xbf16>, vector<16x32xf32> -> vector<16x32xf32>
    %64 = arith.addf %37, %63 : vector<16x32xf32>
    %65 = vector.extract_strided_slice %36 {offsets = [0, 8], sizes = [16, 8], strides = [1, 1]} : vector<16x96xf32> to vector<16x8xf32>
    %66 = vector.extract_strided_slice %36 {offsets = [0, 40], sizes = [16, 8], strides = [1, 1]} : vector<16x96xf32> to vector<16x8xf32>
    %67 = vector.extract_strided_slice %36 {offsets = [0, 72], sizes = [16, 8], strides = [1, 1]} : vector<16x96xf32> to vector<16x8xf32>
    %68 = arith.truncf %65 : vector<16x8xf32> to vector<16x8xbf16>
    %69 = arith.truncf %66 : vector<16x8xf32> to vector<16x8xbf16>
    %cst_34 = arith.constant dense<0.000000e+00> : vector<16x16xf32>
    %70 = tpu.matmul %68, %69, %cst_34 {dimension_numbers = #tpu.dot_dimension_numbers<[1], [1], [0], [0], [0, 0, 1, 0], [], []>} : vector<16x8xbf16>, vector<16x8xbf16>, vector<16x16xf32> -> vector<16x16xf32>
    %cst_35 = arith.constant 0.353553385 : f32
    %71 = vector.broadcast %cst_35 : f32 to vector<16x16xf32>
    %72 = arith.mulf %70, %71 : vector<16x16xf32>
    %73 = arith.addf %72, %0 : vector<16x16xf32>
    %cst_36 = arith.constant dense<0xFF800000> : vector<16xf32>
    %74 = vector.multi_reduction <maximumf>, %73, %cst_36 [1] : vector<16x16xf32> to vector<16xf32>
    %75 = vector.shape_cast %74 : vector<16xf32> to vector<16x1xf32>
    %76 = vector.broadcast %75 : vector<16x1xf32> to vector<16x16xf32>
    %77 = arith.subf %73, %76 : vector<16x16xf32>
    %78 = math.exp %77 : vector<16x16xf32>
    %cst_37 = arith.constant dense<0.000000e+00> : vector<16xf32>
    %79 = vector.multi_reduction <add>, %78, %cst_37 [1] : vector<16x16xf32> to vector<16xf32>
    %80 = vector.shape_cast %79 : vector<16xf32> to vector<16x1xf32>
    %81 = tpu.reciprocal %80 {approx = true} : vector<16x1xf32> -> vector<16x1xf32>
    %82 = vector.broadcast %81 : vector<16x1xf32> to vector<16x16xf32>
    %83 = arith.mulf %78, %82 : vector<16x16xf32>
    %84 = arith.truncf %83 : vector<16x16xf32> to vector<16x16xbf16>
    %85 = arith.truncf %67 : vector<16x8xf32> to vector<16x8xbf16>
    %cst_38 = arith.constant dense<0.000000e+00> : vector<16x8xf32>
    %86 = tpu.matmul %84, %85, %cst_38 {dimension_numbers = #tpu.dot_dimension_numbers<[1], [0], [0], [1], [0, 0, 1, 1], [], []>} : vector<16x16xbf16>, vector<16x8xbf16>, vector<16x8xf32> -> vector<16x8xf32>
    %c0_39 = arith.constant 0 : index
    %c0_40 = arith.constant 0 : index
    %c8 = arith.constant 8 : index
    %c0_41 = arith.constant 0 : index
    %87 = vector.load %arg7[%c0_39, %c0_40, %c8, %c0_41] : memref<1x2x32x32xbf16, #tpu.memory_space<vmem>>, vector<1x1x8x32xbf16>
    %88 = vector.shape_cast %87 : vector<1x1x8x32xbf16> to vector<8x32xbf16>
    %89 = arith.truncf %86 : vector<16x8xf32> to vector<16x8xbf16>
    %cst_42 = arith.constant dense<0.000000e+00> : vector<16x32xf32>
    %90 = tpu.matmul %89, %88, %cst_42 {dimension_numbers = #tpu.dot_dimension_numbers<[1], [0], [0], [1], [0, 0, 1, 1], [], []>} : vector<16x8xbf16>, vector<8x32xbf16>, vector<16x32xf32> -> vector<16x32xf32>
    %91 = arith.addf %64, %90 : vector<16x32xf32>
    %92 = vector.extract_strided_slice %36 {offsets = [0, 16], sizes = [16, 8], strides = [1, 1]} : vector<16x96xf32> to vector<16x8xf32>
    %93 = vector.extract_strided_slice %36 {offsets = [0, 48], sizes = [16, 8], strides = [1, 1]} : vector<16x96xf32> to vector<16x8xf32>
    %94 = vector.extract_strided_slice %36 {offsets = [0, 80], sizes = [16, 8], strides = [1, 1]} : vector<16x96xf32> to vector<16x8xf32>
    %95 = arith.truncf %92 : vector<16x8xf32> to vector<16x8xbf16>
    %96 = arith.truncf %93 : vector<16x8xf32> to vector<16x8xbf16>
    %cst_43 = arith.constant dense<0.000000e+00> : vector<16x16xf32>
    %97 = tpu.matmul %95, %96, %cst_43 {dimension_numbers = #tpu.dot_dimension_numbers<[1], [1], [0], [0], [0, 0, 1, 0], [], []>} : vector<16x8xbf16>, vector<16x8xbf16>, vector<16x16xf32> -> vector<16x16xf32>
    %cst_44 = arith.constant 0.353553385 : f32
    %98 = vector.broadcast %cst_44 : f32 to vector<16x16xf32>
    %99 = arith.mulf %97, %98 : vector<16x16xf32>
    %100 = arith.addf %99, %0 : vector<16x16xf32>
    %cst_45 = arith.constant dense<0xFF800000> : vector<16xf32>
    %101 = vector.multi_reduction <maximumf>, %100, %cst_45 [1] : vector<16x16xf32> to vector<16xf32>
    %102 = vector.shape_cast %101 : vector<16xf32> to vector<16x1xf32>
    %103 = vector.broadcast %102 : vector<16x1xf32> to vector<16x16xf32>
    %104 = arith.subf %100, %103 : vector<16x16xf32>
    %105 = math.exp %104 : vector<16x16xf32>
    %cst_46 = arith.constant dense<0.000000e+00> : vector<16xf32>
    %106 = vector.multi_reduction <add>, %105, %cst_46 [1] : vector<16x16xf32> to vector<16xf32>
    %107 = vector.shape_cast %106 : vector<16xf32> to vector<16x1xf32>
    %108 = tpu.reciprocal %107 {approx = true} : vector<16x1xf32> -> vector<16x1xf32>
    %109 = vector.broadcast %108 : vector<16x1xf32> to vector<16x16xf32>
    %110 = arith.mulf %105, %109 : vector<16x16xf32>
    %111 = arith.truncf %110 : vector<16x16xf32> to vector<16x16xbf16>
    %112 = arith.truncf %94 : vector<16x8xf32> to vector<16x8xbf16>
    %cst_47 = arith.constant dense<0.000000e+00> : vector<16x8xf32>
    %113 = tpu.matmul %111, %112, %cst_47 {dimension_numbers = #tpu.dot_dimension_numbers<[1], [0], [0], [1], [0, 0, 1, 1], [], []>} : vector<16x16xbf16>, vector<16x8xbf16>, vector<16x8xf32> -> vector<16x8xf32>
    %c0_48 = arith.constant 0 : index
    %c0_49 = arith.constant 0 : index
    %c16 = arith.constant 16 : index
    %c0_50 = arith.constant 0 : index
    %114 = vector.load %arg7[%c0_48, %c0_49, %c16, %c0_50] : memref<1x2x32x32xbf16, #tpu.memory_space<vmem>>, vector<1x1x8x32xbf16>
    %115 = vector.shape_cast %114 : vector<1x1x8x32xbf16> to vector<8x32xbf16>
    %116 = arith.truncf %113 : vector<16x8xf32> to vector<16x8xbf16>
    %cst_51 = arith.constant dense<0.000000e+00> : vector<16x32xf32>
    %117 = tpu.matmul %116, %115, %cst_51 {dimension_numbers = #tpu.dot_dimension_numbers<[1], [0], [0], [1], [0, 0, 1, 1], [], []>} : vector<16x8xbf16>, vector<8x32xbf16>, vector<16x32xf32> -> vector<16x32xf32>
    %118 = arith.addf %91, %117 : vector<16x32xf32>
    %119 = vector.extract_strided_slice %36 {offsets = [0, 24], sizes = [16, 8], strides = [1, 1]} : vector<16x96xf32> to vector<16x8xf32>
    %120 = vector.extract_strided_slice %36 {offsets = [0, 56], sizes = [16, 8], strides = [1, 1]} : vector<16x96xf32> to vector<16x8xf32>
    %121 = vector.extract_strided_slice %36 {offsets = [0, 88], sizes = [16, 8], strides = [1, 1]} : vector<16x96xf32> to vector<16x8xf32>
    %122 = arith.truncf %119 : vector<16x8xf32> to vector<16x8xbf16>
    %123 = arith.truncf %120 : vector<16x8xf32> to vector<16x8xbf16>
    %cst_52 = arith.constant dense<0.000000e+00> : vector<16x16xf32>
    %124 = tpu.matmul %122, %123, %cst_52 {dimension_numbers = #tpu.dot_dimension_numbers<[1], [1], [0], [0], [0, 0, 1, 0], [], []>} : vector<16x8xbf16>, vector<16x8xbf16>, vector<16x16xf32> -> vector<16x16xf32>
    %cst_53 = arith.constant 0.353553385 : f32
    %125 = vector.broadcast %cst_53 : f32 to vector<16x16xf32>
    %126 = arith.mulf %124, %125 : vector<16x16xf32>
    %127 = arith.addf %126, %0 : vector<16x16xf32>
    %cst_54 = arith.constant dense<0xFF800000> : vector<16xf32>
    %128 = vector.multi_reduction <maximumf>, %127, %cst_54 [1] : vector<16x16xf32> to vector<16xf32>
    %129 = vector.shape_cast %128 : vector<16xf32> to vector<16x1xf32>
    %130 = vector.broadcast %129 : vector<16x1xf32> to vector<16x16xf32>
    %131 = arith.subf %127, %130 : vector<16x16xf32>
    %132 = math.exp %131 : vector<16x16xf32>
    %cst_55 = arith.constant dense<0.000000e+00> : vector<16xf32>
    %133 = vector.multi_reduction <add>, %132, %cst_55 [1] : vector<16x16xf32> to vector<16xf32>
    %134 = vector.shape_cast %133 : vector<16xf32> to vector<16x1xf32>
    %135 = tpu.reciprocal %134 {approx = true} : vector<16x1xf32> -> vector<16x1xf32>
    %136 = vector.broadcast %135 : vector<16x1xf32> to vector<16x16xf32>
    %137 = arith.mulf %132, %136 : vector<16x16xf32>
    %138 = arith.truncf %137 : vector<16x16xf32> to vector<16x16xbf16>
    %139 = arith.truncf %121 : vector<16x8xf32> to vector<16x8xbf16>
    %cst_56 = arith.constant dense<0.000000e+00> : vector<16x8xf32>
    %140 = tpu.matmul %138, %139, %cst_56 {dimension_numbers = #tpu.dot_dimension_numbers<[1], [0], [0], [1], [0, 0, 1, 1], [], []>} : vector<16x16xbf16>, vector<16x8xbf16>, vector<16x8xf32> -> vector<16x8xf32>
    %c0_57 = arith.constant 0 : index
    %c0_58 = arith.constant 0 : index
    %c24 = arith.constant 24 : index
    %c0_59 = arith.constant 0 : index
    %141 = vector.load %arg7[%c0_57, %c0_58, %c24, %c0_59] : memref<1x2x32x32xbf16, #tpu.memory_space<vmem>>, vector<1x1x8x32xbf16>
    %142 = vector.shape_cast %141 : vector<1x1x8x32xbf16> to vector<8x32xbf16>
    %143 = arith.truncf %140 : vector<16x8xf32> to vector<16x8xbf16>
    %cst_60 = arith.constant dense<0.000000e+00> : vector<16x32xf32>
    %144 = tpu.matmul %143, %142, %cst_60 {dimension_numbers = #tpu.dot_dimension_numbers<[1], [0], [0], [1], [0, 0, 1, 1], [], []>} : vector<16x8xbf16>, vector<8x32xbf16>, vector<16x32xf32> -> vector<16x32xf32>
    %145 = arith.addf %118, %144 : vector<16x32xf32>
    %146 = arith.addf %28, %145 : vector<16x32xf32>
    %c0_61 = arith.constant 0 : index
    %c0_62 = arith.constant 0 : index
    %c0_63 = arith.constant 0 : index
    %c0_64 = arith.constant 0 : index
    %147 = vector.load %arg8[%c0_61, %c0_62, %c0_63, %c0_64] : memref<1x2x1x32xf32, #tpu.memory_space<vmem>>, vector<1x1x1x32xf32>
    %148 = vector.shape_cast %147 : vector<1x1x1x32xf32> to vector<1x32xf32>
    %149 = vector.broadcast %148 : vector<1x32xf32> to vector<16x32xf32>
    %150 = arith.addf %146, %149 : vector<16x32xf32>
    %c0_65 = arith.constant 0 : index
    %c0_66 = arith.constant 0 : index
    %c0_67 = arith.constant 0 : index
    %c0_68 = arith.constant 0 : index
    %151 = vector.load %arg9[%c0_65, %c0_66, %c0_67, %c0_68] : memref<1x2x1x32xf32, #tpu.memory_space<vmem>>, vector<1x1x1x32xf32>
    %152 = vector.shape_cast %151 : vector<1x1x1x32xf32> to vector<1x32xf32>
    %c0_69 = arith.constant 0 : index
    %c0_70 = arith.constant 0 : index
    %c0_71 = arith.constant 0 : index
    %c0_72 = arith.constant 0 : index
    %153 = vector.load %arg10[%c0_69, %c0_70, %c0_71, %c0_72] : memref<1x2x1x32xf32, #tpu.memory_space<vmem>>, vector<1x1x1x32xf32>
    %154 = vector.shape_cast %153 : vector<1x1x1x32xf32> to vector<1x32xf32>
    %cst_73 = arith.constant dense<0.000000e+00> : vector<16xf32>
    %155 = vector.multi_reduction <add>, %150, %cst_73 [1] : vector<16x32xf32> to vector<16xf32>
    %156 = vector.shape_cast %155 : vector<16xf32> to vector<16x1xf32>
    %cst_74 = arith.constant 3.200000e+01 : f32
    %157 = vector.broadcast %cst_74 : f32 to vector<16x1xf32>
    %158 = arith.divf %156, %157 : vector<16x1xf32>
    %159 = vector.broadcast %158 : vector<16x1xf32> to vector<16x32xf32>
    %160 = arith.subf %150, %159 : vector<16x32xf32>
    %161 = arith.mulf %160, %160 : vector<16x32xf32>
    %cst_75 = arith.constant dense<0.000000e+00> : vector<16xf32>
    %162 = vector.multi_reduction <add>, %161, %cst_75 [1] : vector<16x32xf32> to vector<16xf32>
    %163 = vector.shape_cast %162 : vector<16xf32> to vector<16x1xf32>
    %cst_76 = arith.constant 3.200000e+01 : f32
    %164 = vector.broadcast %cst_76 : f32 to vector<16x1xf32>
    %165 = arith.divf %163, %164 : vector<16x1xf32>
    %cst_77 = arith.constant 9.99999996E-13 : f32
    %166 = vector.broadcast %cst_77 : f32 to vector<16x1xf32>
    %167 = arith.addf %165, %166 : vector<16x1xf32>
    %168 = math.rsqrt %167 : vector<16x1xf32>
    %169 = vector.broadcast %158 : vector<16x1xf32> to vector<16x32xf32>
    %170 = arith.subf %150, %169 : vector<16x32xf32>
    %171 = vector.broadcast %168 : vector<16x1xf32> to vector<16x32xf32>
    %172 = arith.mulf %170, %171 : vector<16x32xf32>
    %173 = vector.broadcast %152 : vector<1x32xf32> to vector<16x32xf32>
    %174 = arith.mulf %172, %173 : vector<16x32xf32>
    %175 = vector.broadcast %154 : vector<1x32xf32> to vector<16x32xf32>
    %176 = arith.addf %174, %175 : vector<16x32xf32>
    %c0_78 = arith.constant 0 : index
    %c0_79 = arith.constant 0 : index
    %c0_80 = arith.constant 0 : index
    %c0_81 = arith.constant 0 : index
    %177 = vector.load %arg11[%c0_78, %c0_79, %c0_80, %c0_81] : memref<1x2x32x64xbf16, #tpu.memory_space<vmem>>, vector<1x1x32x64xbf16>
    %178 = vector.shape_cast %177 : vector<1x1x32x64xbf16> to vector<32x64xbf16>
    %179 = arith.truncf %176 : vector<16x32xf32> to vector<16x32xbf16>
    %cst_82 = arith.constant dense<0.000000e+00> : vector<16x64xf32>
    %180 = tpu.matmul %179, %178, %cst_82 {dimension_numbers = #tpu.dot_dimension_numbers<[1], [0], [0], [1], [0, 0, 1, 1], [], []>} : vector<16x32xbf16>, vector<32x64xbf16>, vector<16x64xf32> -> vector<16x64xf32>
    %c0_83 = arith.constant 0 : index
    %c0_84 = arith.constant 0 : index
    %c0_85 = arith.constant 0 : index
    %c0_86 = arith.constant 0 : index
    %181 = vector.load %arg12[%c0_83, %c0_84, %c0_85, %c0_86] : memref<1x2x1x64xf32, #tpu.memory_space<vmem>>, vector<1x1x1x64xf32>
    %182 = vector.shape_cast %181 : vector<1x1x1x64xf32> to vector<1x64xf32>
    %183 = vector.broadcast %182 : vector<1x64xf32> to vector<16x64xf32>
    %184 = arith.addf %180, %183 : vector<16x64xf32>
    %cst_87 = arith.constant 5.000000e-01 : f32
    %185 = vector.broadcast %cst_87 : f32 to vector<16x64xf32>
    %186 = arith.mulf %185, %184 : vector<16x64xf32>
    %cst_88 = arith.constant 4.471500e-02 : f32
    %187 = vector.broadcast %cst_88 : f32 to vector<16x64xf32>
    %188 = arith.mulf %187, %184 : vector<16x64xf32>
    %189 = arith.mulf %188, %184 : vector<16x64xf32>
    %190 = arith.mulf %189, %184 : vector<16x64xf32>
    %191 = arith.addf %184, %190 : vector<16x64xf32>
    %cst_89 = arith.constant 0.797884583 : f32
    %192 = vector.broadcast %cst_89 : f32 to vector<16x64xf32>
    %193 = arith.mulf %192, %191 : vector<16x64xf32>
    %194 = math.tanh %193 : vector<16x64xf32>
    %cst_90 = arith.constant 1.000000e+00 : f32
    %195 = vector.broadcast %cst_90 : f32 to vector<16x64xf32>
    %196 = arith.addf %195, %194 : vector<16x64xf32>
    %197 = arith.mulf %186, %196 : vector<16x64xf32>
    %c0_91 = arith.constant 0 : index
    %c0_92 = arith.constant 0 : index
    %c0_93 = arith.constant 0 : index
    %c0_94 = arith.constant 0 : index
    %198 = vector.load %arg13[%c0_91, %c0_92, %c0_93, %c0_94] : memref<1x2x64x32xbf16, #tpu.memory_space<vmem>>, vector<1x1x64x32xbf16>
    %199 = vector.shape_cast %198 : vector<1x1x64x32xbf16> to vector<64x32xbf16>
    %200 = arith.truncf %197 : vector<16x64xf32> to vector<16x64xbf16>
    %cst_95 = arith.constant dense<0.000000e+00> : vector<16x32xf32>
    %201 = tpu.matmul %200, %199, %cst_95 {dimension_numbers = #tpu.dot_dimension_numbers<[1], [0], [0], [1], [0, 0, 1, 1], [], []>} : vector<16x64xbf16>, vector<64x32xbf16>, vector<16x32xf32> -> vector<16x32xf32>
    %c0_96 = arith.constant 0 : index
    %c0_97 = arith.constant 0 : index
    %c0_98 = arith.constant 0 : index
    %c0_99 = arith.constant 0 : index
    %202 = vector.load %arg14[%c0_96, %c0_97, %c0_98, %c0_99] : memref<1x2x1x32xf32, #tpu.memory_space<vmem>>, vector<1x1x1x32xf32>
    %203 = vector.shape_cast %202 : vector<1x1x1x32xf32> to vector<1x32xf32>
    %204 = vector.broadcast %203 : vector<1x32xf32> to vector<16x32xf32>
    %205 = arith.addf %201, %204 : vector<16x32xf32>
    %206 = arith.addf %176, %205 : vector<16x32xf32>
    %c0_100 = arith.constant 0 : index
    %c0_101 = arith.constant 0 : index
    %c0_102 = arith.constant 0 : index
    %c0_103 = arith.constant 0 : index
    %207 = vector.load %arg15[%c0_100, %c0_101, %c0_102, %c0_103] : memref<1x2x1x32xf32, #tpu.memory_space<vmem>>, vector<1x1x1x32xf32>
    %208 = vector.shape_cast %207 : vector<1x1x1x32xf32> to vector<1x32xf32>
    %c0_104 = arith.constant 0 : index
    %c0_105 = arith.constant 0 : index
    %c0_106 = arith.constant 0 : index
    %c0_107 = arith.constant 0 : index
    %209 = vector.load %arg16[%c0_104, %c0_105, %c0_106, %c0_107] : memref<1x2x1x32xf32, #tpu.memory_space<vmem>>, vector<1x1x1x32xf32>
    %210 = vector.shape_cast %209 : vector<1x1x1x32xf32> to vector<1x32xf32>
    %cst_108 = arith.constant dense<0.000000e+00> : vector<16xf32>
    %211 = vector.multi_reduction <add>, %206, %cst_108 [1] : vector<16x32xf32> to vector<16xf32>
    %212 = vector.shape_cast %211 : vector<16xf32> to vector<16x1xf32>
    %cst_109 = arith.constant 3.200000e+01 : f32
    %213 = vector.broadcast %cst_109 : f32 to vector<16x1xf32>
    %214 = arith.divf %212, %213 : vector<16x1xf32>
    %215 = vector.broadcast %214 : vector<16x1xf32> to vector<16x32xf32>
    %216 = arith.subf %206, %215 : vector<16x32xf32>
    %217 = arith.mulf %216, %216 : vector<16x32xf32>
    %cst_110 = arith.constant dense<0.000000e+00> : vector<16xf32>
    %218 = vector.multi_reduction <add>, %217, %cst_110 [1] : vector<16x32xf32> to vector<16xf32>
    %219 = vector.shape_cast %218 : vector<16xf32> to vector<16x1xf32>
    %cst_111 = arith.constant 3.200000e+01 : f32
    %220 = vector.broadcast %cst_111 : f32 to vector<16x1xf32>
    %221 = arith.divf %219, %220 : vector<16x1xf32>
    %cst_112 = arith.constant 9.99999996E-13 : f32
    %222 = vector.broadcast %cst_112 : f32 to vector<16x1xf32>
    %223 = arith.addf %221, %222 : vector<16x1xf32>
    %224 = math.rsqrt %223 : vector<16x1xf32>
    %225 = vector.broadcast %214 : vector<16x1xf32> to vector<16x32xf32>
    %226 = arith.subf %206, %225 : vector<16x32xf32>
    %227 = vector.broadcast %224 : vector<16x1xf32> to vector<16x32xf32>
    %228 = arith.mulf %226, %227 : vector<16x32xf32>
    %229 = vector.broadcast %208 : vector<1x32xf32> to vector<16x32xf32>
    %230 = arith.mulf %228, %229 : vector<16x32xf32>
    %231 = vector.broadcast %210 : vector<1x32xf32> to vector<16x32xf32>
    %232 = arith.addf %230, %231 : vector<16x32xf32>
    %c0_113 = arith.constant 0 : index
    %c1 = arith.constant 1 : index
    %c0_114 = arith.constant 0 : index
    %c0_115 = arith.constant 0 : index
    %233 = vector.load %arg5[%c0_113, %c1, %c0_114, %c0_115] : memref<1x2x32x96xbf16, #tpu.memory_space<vmem>>, vector<1x1x32x96xbf16>
    %234 = vector.shape_cast %233 : vector<1x1x32x96xbf16> to vector<32x96xbf16>
    %235 = arith.truncf %232 : vector<16x32xf32> to vector<16x32xbf16>
    %cst_116 = arith.constant dense<0.000000e+00> : vector<16x96xf32>
    %236 = tpu.matmul %235, %234, %cst_116 {dimension_numbers = #tpu.dot_dimension_numbers<[1], [0], [0], [1], [0, 0, 1, 1], [], []>} : vector<16x32xbf16>, vector<32x96xbf16>, vector<16x96xf32> -> vector<16x96xf32>
    %c0_117 = arith.constant 0 : index
    %c1_118 = arith.constant 1 : index
    %c0_119 = arith.constant 0 : index
    %c0_120 = arith.constant 0 : index
    %237 = vector.load %arg6[%c0_117, %c1_118, %c0_119, %c0_120] : memref<1x2x1x96xf32, #tpu.memory_space<vmem>>, vector<1x1x1x96xf32>
    %238 = vector.shape_cast %237 : vector<1x1x1x96xf32> to vector<1x96xf32>
    %239 = vector.broadcast %238 : vector<1x96xf32> to vector<16x96xf32>
    %240 = arith.addf %236, %239 : vector<16x96xf32>
    %cst_121 = arith.constant 0.000000e+00 : f32
    %241 = vector.broadcast %cst_121 : f32 to vector<16x32xf32>
    %242 = vector.extract_strided_slice %240 {offsets = [0, 0], sizes = [16, 8], strides = [1, 1]} : vector<16x96xf32> to vector<16x8xf32>
    %243 = vector.extract_strided_slice %240 {offsets = [0, 32], sizes = [16, 8], strides = [1, 1]} : vector<16x96xf32> to vector<16x8xf32>
    %244 = vector.extract_strided_slice %240 {offsets = [0, 64], sizes = [16, 8], strides = [1, 1]} : vector<16x96xf32> to vector<16x8xf32>
    %245 = arith.truncf %242 : vector<16x8xf32> to vector<16x8xbf16>
    %246 = arith.truncf %243 : vector<16x8xf32> to vector<16x8xbf16>
    %cst_122 = arith.constant dense<0.000000e+00> : vector<16x16xf32>
    %247 = tpu.matmul %245, %246, %cst_122 {dimension_numbers = #tpu.dot_dimension_numbers<[1], [1], [0], [0], [0, 0, 1, 0], [], []>} : vector<16x8xbf16>, vector<16x8xbf16>, vector<16x16xf32> -> vector<16x16xf32>
    %cst_123 = arith.constant 0.353553385 : f32
    %248 = vector.broadcast %cst_123 : f32 to vector<16x16xf32>
    %249 = arith.mulf %247, %248 : vector<16x16xf32>
    %250 = arith.addf %249, %0 : vector<16x16xf32>
    %cst_124 = arith.constant dense<0xFF800000> : vector<16xf32>
    %251 = vector.multi_reduction <maximumf>, %250, %cst_124 [1] : vector<16x16xf32> to vector<16xf32>
    %252 = vector.shape_cast %251 : vector<16xf32> to vector<16x1xf32>
    %253 = vector.broadcast %252 : vector<16x1xf32> to vector<16x16xf32>
    %254 = arith.subf %250, %253 : vector<16x16xf32>
    %255 = math.exp %254 : vector<16x16xf32>
    %cst_125 = arith.constant dense<0.000000e+00> : vector<16xf32>
    %256 = vector.multi_reduction <add>, %255, %cst_125 [1] : vector<16x16xf32> to vector<16xf32>
    %257 = vector.shape_cast %256 : vector<16xf32> to vector<16x1xf32>
    %258 = tpu.reciprocal %257 {approx = true} : vector<16x1xf32> -> vector<16x1xf32>
    %259 = vector.broadcast %258 : vector<16x1xf32> to vector<16x16xf32>
    %260 = arith.mulf %255, %259 : vector<16x16xf32>
    %261 = arith.truncf %260 : vector<16x16xf32> to vector<16x16xbf16>
    %262 = arith.truncf %244 : vector<16x8xf32> to vector<16x8xbf16>
    %cst_126 = arith.constant dense<0.000000e+00> : vector<16x8xf32>
    %263 = tpu.matmul %261, %262, %cst_126 {dimension_numbers = #tpu.dot_dimension_numbers<[1], [0], [0], [1], [0, 0, 1, 1], [], []>} : vector<16x16xbf16>, vector<16x8xbf16>, vector<16x8xf32> -> vector<16x8xf32>
    %c0_127 = arith.constant 0 : index
    %c1_128 = arith.constant 1 : index
    %c0_129 = arith.constant 0 : index
    %c0_130 = arith.constant 0 : index
    %264 = vector.load %arg7[%c0_127, %c1_128, %c0_129, %c0_130] : memref<1x2x32x32xbf16, #tpu.memory_space<vmem>>, vector<1x1x8x32xbf16>
    %265 = vector.shape_cast %264 : vector<1x1x8x32xbf16> to vector<8x32xbf16>
    %266 = arith.truncf %263 : vector<16x8xf32> to vector<16x8xbf16>
    %cst_131 = arith.constant dense<0.000000e+00> : vector<16x32xf32>
    %267 = tpu.matmul %266, %265, %cst_131 {dimension_numbers = #tpu.dot_dimension_numbers<[1], [0], [0], [1], [0, 0, 1, 1], [], []>} : vector<16x8xbf16>, vector<8x32xbf16>, vector<16x32xf32> -> vector<16x32xf32>
    %268 = arith.addf %241, %267 : vector<16x32xf32>
    %269 = vector.extract_strided_slice %240 {offsets = [0, 8], sizes = [16, 8], strides = [1, 1]} : vector<16x96xf32> to vector<16x8xf32>
    %270 = vector.extract_strided_slice %240 {offsets = [0, 40], sizes = [16, 8], strides = [1, 1]} : vector<16x96xf32> to vector<16x8xf32>
    %271 = vector.extract_strided_slice %240 {offsets = [0, 72], sizes = [16, 8], strides = [1, 1]} : vector<16x96xf32> to vector<16x8xf32>
    %272 = arith.truncf %269 : vector<16x8xf32> to vector<16x8xbf16>
    %273 = arith.truncf %270 : vector<16x8xf32> to vector<16x8xbf16>
    %cst_132 = arith.constant dense<0.000000e+00> : vector<16x16xf32>
    %274 = tpu.matmul %272, %273, %cst_132 {dimension_numbers = #tpu.dot_dimension_numbers<[1], [1], [0], [0], [0, 0, 1, 0], [], []>} : vector<16x8xbf16>, vector<16x8xbf16>, vector<16x16xf32> -> vector<16x16xf32>
    %cst_133 = arith.constant 0.353553385 : f32
    %275 = vector.broadcast %cst_133 : f32 to vector<16x16xf32>
    %276 = arith.mulf %274, %275 : vector<16x16xf32>
    %277 = arith.addf %276, %0 : vector<16x16xf32>
    %cst_134 = arith.constant dense<0xFF800000> : vector<16xf32>
    %278 = vector.multi_reduction <maximumf>, %277, %cst_134 [1] : vector<16x16xf32> to vector<16xf32>
    %279 = vector.shape_cast %278 : vector<16xf32> to vector<16x1xf32>
    %280 = vector.broadcast %279 : vector<16x1xf32> to vector<16x16xf32>
    %281 = arith.subf %277, %280 : vector<16x16xf32>
    %282 = math.exp %281 : vector<16x16xf32>
    %cst_135 = arith.constant dense<0.000000e+00> : vector<16xf32>
    %283 = vector.multi_reduction <add>, %282, %cst_135 [1] : vector<16x16xf32> to vector<16xf32>
    %284 = vector.shape_cast %283 : vector<16xf32> to vector<16x1xf32>
    %285 = tpu.reciprocal %284 {approx = true} : vector<16x1xf32> -> vector<16x1xf32>
    %286 = vector.broadcast %285 : vector<16x1xf32> to vector<16x16xf32>
    %287 = arith.mulf %282, %286 : vector<16x16xf32>
    %288 = arith.truncf %287 : vector<16x16xf32> to vector<16x16xbf16>
    %289 = arith.truncf %271 : vector<16x8xf32> to vector<16x8xbf16>
    %cst_136 = arith.constant dense<0.000000e+00> : vector<16x8xf32>
    %290 = tpu.matmul %288, %289, %cst_136 {dimension_numbers = #tpu.dot_dimension_numbers<[1], [0], [0], [1], [0, 0, 1, 1], [], []>} : vector<16x16xbf16>, vector<16x8xbf16>, vector<16x8xf32> -> vector<16x8xf32>
    %c0_137 = arith.constant 0 : index
    %c1_138 = arith.constant 1 : index
    %c8_139 = arith.constant 8 : index
    %c0_140 = arith.constant 0 : index
    %291 = vector.load %arg7[%c0_137, %c1_138, %c8_139, %c0_140] : memref<1x2x32x32xbf16, #tpu.memory_space<vmem>>, vector<1x1x8x32xbf16>
    %292 = vector.shape_cast %291 : vector<1x1x8x32xbf16> to vector<8x32xbf16>
    %293 = arith.truncf %290 : vector<16x8xf32> to vector<16x8xbf16>
    %cst_141 = arith.constant dense<0.000000e+00> : vector<16x32xf32>
    %294 = tpu.matmul %293, %292, %cst_141 {dimension_numbers = #tpu.dot_dimension_numbers<[1], [0], [0], [1], [0, 0, 1, 1], [], []>} : vector<16x8xbf16>, vector<8x32xbf16>, vector<16x32xf32> -> vector<16x32xf32>
    %295 = arith.addf %268, %294 : vector<16x32xf32>
    %296 = vector.extract_strided_slice %240 {offsets = [0, 16], sizes = [16, 8], strides = [1, 1]} : vector<16x96xf32> to vector<16x8xf32>
    %297 = vector.extract_strided_slice %240 {offsets = [0, 48], sizes = [16, 8], strides = [1, 1]} : vector<16x96xf32> to vector<16x8xf32>
    %298 = vector.extract_strided_slice %240 {offsets = [0, 80], sizes = [16, 8], strides = [1, 1]} : vector<16x96xf32> to vector<16x8xf32>
    %299 = arith.truncf %296 : vector<16x8xf32> to vector<16x8xbf16>
    %300 = arith.truncf %297 : vector<16x8xf32> to vector<16x8xbf16>
    %cst_142 = arith.constant dense<0.000000e+00> : vector<16x16xf32>
    %301 = tpu.matmul %299, %300, %cst_142 {dimension_numbers = #tpu.dot_dimension_numbers<[1], [1], [0], [0], [0, 0, 1, 0], [], []>} : vector<16x8xbf16>, vector<16x8xbf16>, vector<16x16xf32> -> vector<16x16xf32>
    %cst_143 = arith.constant 0.353553385 : f32
    %302 = vector.broadcast %cst_143 : f32 to vector<16x16xf32>
    %303 = arith.mulf %301, %302 : vector<16x16xf32>
    %304 = arith.addf %303, %0 : vector<16x16xf32>
    %cst_144 = arith.constant dense<0xFF800000> : vector<16xf32>
    %305 = vector.multi_reduction <maximumf>, %304, %cst_144 [1] : vector<16x16xf32> to vector<16xf32>
    %306 = vector.shape_cast %305 : vector<16xf32> to vector<16x1xf32>
    %307 = vector.broadcast %306 : vector<16x1xf32> to vector<16x16xf32>
    %308 = arith.subf %304, %307 : vector<16x16xf32>
    %309 = math.exp %308 : vector<16x16xf32>
    %cst_145 = arith.constant dense<0.000000e+00> : vector<16xf32>
    %310 = vector.multi_reduction <add>, %309, %cst_145 [1] : vector<16x16xf32> to vector<16xf32>
    %311 = vector.shape_cast %310 : vector<16xf32> to vector<16x1xf32>
    %312 = tpu.reciprocal %311 {approx = true} : vector<16x1xf32> -> vector<16x1xf32>
    %313 = vector.broadcast %312 : vector<16x1xf32> to vector<16x16xf32>
    %314 = arith.mulf %309, %313 : vector<16x16xf32>
    %315 = arith.truncf %314 : vector<16x16xf32> to vector<16x16xbf16>
    %316 = arith.truncf %298 : vector<16x8xf32> to vector<16x8xbf16>
    %cst_146 = arith.constant dense<0.000000e+00> : vector<16x8xf32>
    %317 = tpu.matmul %315, %316, %cst_146 {dimension_numbers = #tpu.dot_dimension_numbers<[1], [0], [0], [1], [0, 0, 1, 1], [], []>} : vector<16x16xbf16>, vector<16x8xbf16>, vector<16x8xf32> -> vector<16x8xf32>
    %c0_147 = arith.constant 0 : index
    %c1_148 = arith.constant 1 : index
    %c16_149 = arith.constant 16 : index
    %c0_150 = arith.constant 0 : index
    %318 = vector.load %arg7[%c0_147, %c1_148, %c16_149, %c0_150] : memref<1x2x32x32xbf16, #tpu.memory_space<vmem>>, vector<1x1x8x32xbf16>
    %319 = vector.shape_cast %318 : vector<1x1x8x32xbf16> to vector<8x32xbf16>
    %320 = arith.truncf %317 : vector<16x8xf32> to vector<16x8xbf16>
    %cst_151 = arith.constant dense<0.000000e+00> : vector<16x32xf32>
    %321 = tpu.matmul %320, %319, %cst_151 {dimension_numbers = #tpu.dot_dimension_numbers<[1], [0], [0], [1], [0, 0, 1, 1], [], []>} : vector<16x8xbf16>, vector<8x32xbf16>, vector<16x32xf32> -> vector<16x32xf32>
    %322 = arith.addf %295, %321 : vector<16x32xf32>
    %323 = vector.extract_strided_slice %240 {offsets = [0, 24], sizes = [16, 8], strides = [1, 1]} : vector<16x96xf32> to vector<16x8xf32>
    %324 = vector.extract_strided_slice %240 {offsets = [0, 56], sizes = [16, 8], strides = [1, 1]} : vector<16x96xf32> to vector<16x8xf32>
    %325 = vector.extract_strided_slice %240 {offsets = [0, 88], sizes = [16, 8], strides = [1, 1]} : vector<16x96xf32> to vector<16x8xf32>
    %326 = arith.truncf %323 : vector<16x8xf32> to vector<16x8xbf16>
    %327 = arith.truncf %324 : vector<16x8xf32> to vector<16x8xbf16>
    %cst_152 = arith.constant dense<0.000000e+00> : vector<16x16xf32>
    %328 = tpu.matmul %326, %327, %cst_152 {dimension_numbers = #tpu.dot_dimension_numbers<[1], [1], [0], [0], [0, 0, 1, 0], [], []>} : vector<16x8xbf16>, vector<16x8xbf16>, vector<16x16xf32> -> vector<16x16xf32>
    %cst_153 = arith.constant 0.353553385 : f32
    %329 = vector.broadcast %cst_153 : f32 to vector<16x16xf32>
    %330 = arith.mulf %328, %329 : vector<16x16xf32>
    %331 = arith.addf %330, %0 : vector<16x16xf32>
    %cst_154 = arith.constant dense<0xFF800000> : vector<16xf32>
    %332 = vector.multi_reduction <maximumf>, %331, %cst_154 [1] : vector<16x16xf32> to vector<16xf32>
    %333 = vector.shape_cast %332 : vector<16xf32> to vector<16x1xf32>
    %334 = vector.broadcast %333 : vector<16x1xf32> to vector<16x16xf32>
    %335 = arith.subf %331, %334 : vector<16x16xf32>
    %336 = math.exp %335 : vector<16x16xf32>
    %cst_155 = arith.constant dense<0.000000e+00> : vector<16xf32>
    %337 = vector.multi_reduction <add>, %336, %cst_155 [1] : vector<16x16xf32> to vector<16xf32>
    %338 = vector.shape_cast %337 : vector<16xf32> to vector<16x1xf32>
    %339 = tpu.reciprocal %338 {approx = true} : vector<16x1xf32> -> vector<16x1xf32>
    %340 = vector.broadcast %339 : vector<16x1xf32> to vector<16x16xf32>
    %341 = arith.mulf %336, %340 : vector<16x16xf32>
    %342 = arith.truncf %341 : vector<16x16xf32> to vector<16x16xbf16>
    %343 = arith.truncf %325 : vector<16x8xf32> to vector<16x8xbf16>
    %cst_156 = arith.constant dense<0.000000e+00> : vector<16x8xf32>
    %344 = tpu.matmul %342, %343, %cst_156 {dimension_numbers = #tpu.dot_dimension_numbers<[1], [0], [0], [1], [0, 0, 1, 1], [], []>} : vector<16x16xbf16>, vector<16x8xbf16>, vector<16x8xf32> -> vector<16x8xf32>
    %c0_157 = arith.constant 0 : index
    %c1_158 = arith.constant 1 : index
    %c24_159 = arith.constant 24 : index
    %c0_160 = arith.constant 0 : index
    %345 = vector.load %arg7[%c0_157, %c1_158, %c24_159, %c0_160] : memref<1x2x32x32xbf16, #tpu.memory_space<vmem>>, vector<1x1x8x32xbf16>
    %346 = vector.shape_cast %345 : vector<1x1x8x32xbf16> to vector<8x32xbf16>
    %347 = arith.truncf %344 : vector<16x8xf32> to vector<16x8xbf16>
    %cst_161 = arith.constant dense<0.000000e+00> : vector<16x32xf32>
    %348 = tpu.matmul %347, %346, %cst_161 {dimension_numbers = #tpu.dot_dimension_numbers<[1], [0], [0], [1], [0, 0, 1, 1], [], []>} : vector<16x8xbf16>, vector<8x32xbf16>, vector<16x32xf32> -> vector<16x32xf32>
    %349 = arith.addf %322, %348 : vector<16x32xf32>
    %350 = arith.addf %232, %349 : vector<16x32xf32>
    %c0_162 = arith.constant 0 : index
    %c1_163 = arith.constant 1 : index
    %c0_164 = arith.constant 0 : index
    %c0_165 = arith.constant 0 : index
    %351 = vector.load %arg8[%c0_162, %c1_163, %c0_164, %c0_165] : memref<1x2x1x32xf32, #tpu.memory_space<vmem>>, vector<1x1x1x32xf32>
    %352 = vector.shape_cast %351 : vector<1x1x1x32xf32> to vector<1x32xf32>
    %353 = vector.broadcast %352 : vector<1x32xf32> to vector<16x32xf32>
    %354 = arith.addf %350, %353 : vector<16x32xf32>
    %c0_166 = arith.constant 0 : index
    %c1_167 = arith.constant 1 : index
    %c0_168 = arith.constant 0 : index
    %c0_169 = arith.constant 0 : index
    %355 = vector.load %arg9[%c0_166, %c1_167, %c0_168, %c0_169] : memref<1x2x1x32xf32, #tpu.memory_space<vmem>>, vector<1x1x1x32xf32>
    %356 = vector.shape_cast %355 : vector<1x1x1x32xf32> to vector<1x32xf32>
    %c0_170 = arith.constant 0 : index
    %c1_171 = arith.constant 1 : index
    %c0_172 = arith.constant 0 : index
    %c0_173 = arith.constant 0 : index
    %357 = vector.load %arg10[%c0_170, %c1_171, %c0_172, %c0_173] : memref<1x2x1x32xf32, #tpu.memory_space<vmem>>, vector<1x1x1x32xf32>
    %358 = vector.shape_cast %357 : vector<1x1x1x32xf32> to vector<1x32xf32>
    %cst_174 = arith.constant dense<0.000000e+00> : vector<16xf32>
    %359 = vector.multi_reduction <add>, %354, %cst_174 [1] : vector<16x32xf32> to vector<16xf32>
    %360 = vector.shape_cast %359 : vector<16xf32> to vector<16x1xf32>
    %cst_175 = arith.constant 3.200000e+01 : f32
    %361 = vector.broadcast %cst_175 : f32 to vector<16x1xf32>
    %362 = arith.divf %360, %361 : vector<16x1xf32>
    %363 = vector.broadcast %362 : vector<16x1xf32> to vector<16x32xf32>
    %364 = arith.subf %354, %363 : vector<16x32xf32>
    %365 = arith.mulf %364, %364 : vector<16x32xf32>
    %cst_176 = arith.constant dense<0.000000e+00> : vector<16xf32>
    %366 = vector.multi_reduction <add>, %365, %cst_176 [1] : vector<16x32xf32> to vector<16xf32>
    %367 = vector.shape_cast %366 : vector<16xf32> to vector<16x1xf32>
    %cst_177 = arith.constant 3.200000e+01 : f32
    %368 = vector.broadcast %cst_177 : f32 to vector<16x1xf32>
    %369 = arith.divf %367, %368 : vector<16x1xf32>
    %cst_178 = arith.constant 9.99999996E-13 : f32
    %370 = vector.broadcast %cst_178 : f32 to vector<16x1xf32>
    %371 = arith.addf %369, %370 : vector<16x1xf32>
    %372 = math.rsqrt %371 : vector<16x1xf32>
    %373 = vector.broadcast %362 : vector<16x1xf32> to vector<16x32xf32>
    %374 = arith.subf %354, %373 : vector<16x32xf32>
    %375 = vector.broadcast %372 : vector<16x1xf32> to vector<16x32xf32>
    %376 = arith.mulf %374, %375 : vector<16x32xf32>
    %377 = vector.broadcast %356 : vector<1x32xf32> to vector<16x32xf32>
    %378 = arith.mulf %376, %377 : vector<16x32xf32>
    %379 = vector.broadcast %358 : vector<1x32xf32> to vector<16x32xf32>
    %380 = arith.addf %378, %379 : vector<16x32xf32>
    %c0_179 = arith.constant 0 : index
    %c1_180 = arith.constant 1 : index
    %c0_181 = arith.constant 0 : index
    %c0_182 = arith.constant 0 : index
    %381 = vector.load %arg11[%c0_179, %c1_180, %c0_181, %c0_182] : memref<1x2x32x64xbf16, #tpu.memory_space<vmem>>, vector<1x1x32x64xbf16>
    %382 = vector.shape_cast %381 : vector<1x1x32x64xbf16> to vector<32x64xbf16>
    %383 = arith.truncf %380 : vector<16x32xf32> to vector<16x32xbf16>
    %cst_183 = arith.constant dense<0.000000e+00> : vector<16x64xf32>
    %384 = tpu.matmul %383, %382, %cst_183 {dimension_numbers = #tpu.dot_dimension_numbers<[1], [0], [0], [1], [0, 0, 1, 1], [], []>} : vector<16x32xbf16>, vector<32x64xbf16>, vector<16x64xf32> -> vector<16x64xf32>
    %c0_184 = arith.constant 0 : index
    %c1_185 = arith.constant 1 : index
    %c0_186 = arith.constant 0 : index
    %c0_187 = arith.constant 0 : index
    %385 = vector.load %arg12[%c0_184, %c1_185, %c0_186, %c0_187] : memref<1x2x1x64xf32, #tpu.memory_space<vmem>>, vector<1x1x1x64xf32>
    %386 = vector.shape_cast %385 : vector<1x1x1x64xf32> to vector<1x64xf32>
    %387 = vector.broadcast %386 : vector<1x64xf32> to vector<16x64xf32>
    %388 = arith.addf %384, %387 : vector<16x64xf32>
    %cst_188 = arith.constant 5.000000e-01 : f32
    %389 = vector.broadcast %cst_188 : f32 to vector<16x64xf32>
    %390 = arith.mulf %389, %388 : vector<16x64xf32>
    %cst_189 = arith.constant 4.471500e-02 : f32
    %391 = vector.broadcast %cst_189 : f32 to vector<16x64xf32>
    %392 = arith.mulf %391, %388 : vector<16x64xf32>
    %393 = arith.mulf %392, %388 : vector<16x64xf32>
    %394 = arith.mulf %393, %388 : vector<16x64xf32>
    %395 = arith.addf %388, %394 : vector<16x64xf32>
    %cst_190 = arith.constant 0.797884583 : f32
    %396 = vector.broadcast %cst_190 : f32 to vector<16x64xf32>
    %397 = arith.mulf %396, %395 : vector<16x64xf32>
    %398 = math.tanh %397 : vector<16x64xf32>
    %cst_191 = arith.constant 1.000000e+00 : f32
    %399 = vector.broadcast %cst_191 : f32 to vector<16x64xf32>
    %400 = arith.addf %399, %398 : vector<16x64xf32>
    %401 = arith.mulf %390, %400 : vector<16x64xf32>
    %c0_192 = arith.constant 0 : index
    %c1_193 = arith.constant 1 : index
    %c0_194 = arith.constant 0 : index
    %c0_195 = arith.constant 0 : index
    %402 = vector.load %arg13[%c0_192, %c1_193, %c0_194, %c0_195] : memref<1x2x64x32xbf16, #tpu.memory_space<vmem>>, vector<1x1x64x32xbf16>
    %403 = vector.shape_cast %402 : vector<1x1x64x32xbf16> to vector<64x32xbf16>
    %404 = arith.truncf %401 : vector<16x64xf32> to vector<16x64xbf16>
    %cst_196 = arith.constant dense<0.000000e+00> : vector<16x32xf32>
    %405 = tpu.matmul %404, %403, %cst_196 {dimension_numbers = #tpu.dot_dimension_numbers<[1], [0], [0], [1], [0, 0, 1, 1], [], []>} : vector<16x64xbf16>, vector<64x32xbf16>, vector<16x32xf32> -> vector<16x32xf32>
    %c0_197 = arith.constant 0 : index
    %c1_198 = arith.constant 1 : index
    %c0_199 = arith.constant 0 : index
    %c0_200 = arith.constant 0 : index
    %406 = vector.load %arg14[%c0_197, %c1_198, %c0_199, %c0_200] : memref<1x2x1x32xf32, #tpu.memory_space<vmem>>, vector<1x1x1x32xf32>
    %407 = vector.shape_cast %406 : vector<1x1x1x32xf32> to vector<1x32xf32>
    %408 = vector.broadcast %407 : vector<1x32xf32> to vector<16x32xf32>
    %409 = arith.addf %405, %408 : vector<16x32xf32>
    %410 = arith.addf %380, %409 : vector<16x32xf32>
    %c0_201 = arith.constant 0 : index
    %c1_202 = arith.constant 1 : index
    %c0_203 = arith.constant 0 : index
    %c0_204 = arith.constant 0 : index
    %411 = vector.load %arg15[%c0_201, %c1_202, %c0_203, %c0_204] : memref<1x2x1x32xf32, #tpu.memory_space<vmem>>, vector<1x1x1x32xf32>
    %412 = vector.shape_cast %411 : vector<1x1x1x32xf32> to vector<1x32xf32>
    %c0_205 = arith.constant 0 : index
    %c1_206 = arith.constant 1 : index
    %c0_207 = arith.constant 0 : index
    %c0_208 = arith.constant 0 : index
    %413 = vector.load %arg16[%c0_205, %c1_206, %c0_207, %c0_208] : memref<1x2x1x32xf32, #tpu.memory_space<vmem>>, vector<1x1x1x32xf32>
    %414 = vector.shape_cast %413 : vector<1x1x1x32xf32> to vector<1x32xf32>
    %cst_209 = arith.constant dense<0.000000e+00> : vector<16xf32>
    %415 = vector.multi_reduction <add>, %410, %cst_209 [1] : vector<16x32xf32> to vector<16xf32>
    %416 = vector.shape_cast %415 : vector<16xf32> to vector<16x1xf32>
    %cst_210 = arith.constant 3.200000e+01 : f32
    %417 = vector.broadcast %cst_210 : f32 to vector<16x1xf32>
    %418 = arith.divf %416, %417 : vector<16x1xf32>
    %419 = vector.broadcast %418 : vector<16x1xf32> to vector<16x32xf32>
    %420 = arith.subf %410, %419 : vector<16x32xf32>
    %421 = arith.mulf %420, %420 : vector<16x32xf32>
    %cst_211 = arith.constant dense<0.000000e+00> : vector<16xf32>
    %422 = vector.multi_reduction <add>, %421, %cst_211 [1] : vector<16x32xf32> to vector<16xf32>
    %423 = vector.shape_cast %422 : vector<16xf32> to vector<16x1xf32>
    %cst_212 = arith.constant 3.200000e+01 : f32
    %424 = vector.broadcast %cst_212 : f32 to vector<16x1xf32>
    %425 = arith.divf %423, %424 : vector<16x1xf32>
    %cst_213 = arith.constant 9.99999996E-13 : f32
    %426 = vector.broadcast %cst_213 : f32 to vector<16x1xf32>
    %427 = arith.addf %425, %426 : vector<16x1xf32>
    %428 = math.rsqrt %427 : vector<16x1xf32>
    %429 = vector.broadcast %418 : vector<16x1xf32> to vector<16x32xf32>
    %430 = arith.subf %410, %429 : vector<16x32xf32>
    %431 = vector.broadcast %428 : vector<16x1xf32> to vector<16x32xf32>
    %432 = arith.mulf %430, %431 : vector<16x32xf32>
    %433 = vector.broadcast %412 : vector<1x32xf32> to vector<16x32xf32>
    %434 = arith.mulf %432, %433 : vector<16x32xf32>
    %435 = vector.broadcast %414 : vector<1x32xf32> to vector<16x32xf32>
    %436 = arith.addf %434, %435 : vector<16x32xf32>
    %437 = vector.shape_cast %436 : vector<16x32xf32> to vector<2x8x32xf32>
    %438 = vector.extract_strided_slice %437 {offsets = [0, 0, 0], sizes = [2, 1, 32], strides = [1, 1, 1]} : vector<2x8x32xf32> to vector<2x1x32xf32>
    %439 = vector.shape_cast %438 : vector<2x1x32xf32> to vector<2x32xf32>
    %c0_214 = arith.constant 0 : index
    %c0_215 = arith.constant 0 : index
    %c0_216 = arith.constant 0 : index
    %440 = vector.load %arg17[%c0_214, %c0_215, %c0_216] : memref<1x32x32xbf16, #tpu.memory_space<vmem>>, vector<1x32x32xbf16>
    %441 = vector.shape_cast %440 : vector<1x32x32xbf16> to vector<32x32xbf16>
    %442 = arith.truncf %439 : vector<2x32xf32> to vector<2x32xbf16>
    %cst_217 = arith.constant dense<0.000000e+00> : vector<2x32xf32>
    %443 = tpu.matmul %442, %441, %cst_217 {dimension_numbers = #tpu.dot_dimension_numbers<[1], [0], [0], [1], [0, 0, 1, 1], [], []>} : vector<2x32xbf16>, vector<32x32xbf16>, vector<2x32xf32> -> vector<2x32xf32>
    %c0_218 = arith.constant 0 : index
    %c0_219 = arith.constant 0 : index
    %c0_220 = arith.constant 0 : index
    %444 = vector.load %arg18[%c0_218, %c0_219, %c0_220] : memref<1x1x32xf32, #tpu.memory_space<vmem>>, vector<1x1x32xf32>
    %445 = vector.shape_cast %444 : vector<1x1x32xf32> to vector<1x32xf32>
    %446 = vector.broadcast %445 : vector<1x32xf32> to vector<2x32xf32>
    %447 = arith.addf %443, %446 : vector<2x32xf32>
    %448 = math.tanh %447 : vector<2x32xf32>
    %c0_221 = arith.constant 0 : index
    %c0_222 = arith.constant 0 : index
    %c0_223 = arith.constant 0 : index
    %449 = vector.load %arg19[%c0_221, %c0_222, %c0_223] : memref<1x2x32xf32, #tpu.memory_space<vmem>>, vector<1x2x32xf32>
    %450 = vector.shape_cast %449 : vector<1x2x32xf32> to vector<2x32xf32>
    %451 = vector.shape_cast %448 : vector<2x32xf32> to vector<1x2x32xf32>
    tpu.vector_store %arg19[%c0_221, %c0_222, %c0_223], %451 {strides = array<i32>} : memref<1x2x32xf32, #tpu.memory_space<vmem>>, vector<1x2x32xf32>,
    return
  }
  func.func @transform_0(%arg0: i32) -> (i32, i32, i32) {
    %c0_i32 = arith.constant 0 : i32
    %c0_i32_0 = arith.constant 0 : i32
    %c0_i32_1 = arith.constant 0 : i32
    return %arg0, %c0_i32, %c0_i32_0 : i32, i32, i32
  }
  func.func @transform_1(%arg0: i32) -> (i32, i32) {
    %c0_i32 = arith.constant 0 : i32
    %c0_i32_0 = arith.constant 0 : i32
    %c0_i32_1 = arith.constant 0 : i32
    return %c0_i32, %c0_i32_0 : i32, i32
  }
  func.func @transform_2(%arg0: i32) -> (i32, i32, i32) {
    %c0_i32 = arith.constant 0 : i32
    %c0_i32_0 = arith.constant 0 : i32
    %c0_i32_1 = arith.constant 0 : i32
    return %arg0, %c0_i32, %c0_i32_0 : i32, i32, i32
  }
  func.func @transform_3(%arg0: i32) -> (i32, i32, i32) {
    %c0_i32 = arith.constant 0 : i32
    %c0_i32_0 = arith.constant 0 : i32
    %c0_i32_1 = arith.constant 0 : i32
    return %arg0, %c0_i32, %c0_i32_0 : i32, i32, i32
  }
  func.func @transform_4(%arg0: i32) -> (i32, i32, i32, i32) {
    %c0_i32 = arith.constant 0 : i32
    %c0_i32_0 = arith.constant 0 : i32
    %c0_i32_1 = arith.constant 0 : i32
    %c0_i32_2 = arith.constant 0 : i32
    return %arg0, %c0_i32, %c0_i32_0, %c0_i32_1 : i32, i32, i32, i32
  }
  func.func @transform_5(%arg0: i32) -> (i32, i32, i32, i32) {
    %c0_i32 = arith.constant 0 : i32
    %c0_i32_0 = arith.constant 0 : i32
    %c0_i32_1 = arith.constant 0 : i32
    %c0_i32_2 = arith.constant 0 : i32
    return %arg0, %c0_i32, %c0_i32_0, %c0_i32_1 : i32, i32, i32, i32
  }
  func.func @transform_6(%arg0: i32) -> (i32, i32, i32, i32) {
    %c0_i32 = arith.constant 0 : i32
    %c0_i32_0 = arith.constant 0 : i32
    %c0_i32_1 = arith.constant 0 : i32
    %c0_i32_2 = arith.constant 0 : i32
    return %arg0, %c0_i32, %c0_i32_0, %c0_i32_1 : i32, i32, i32, i32
  }
  func.func @transform_7(%arg0: i32) -> (i32, i32, i32, i32) {
    %c0_i32 = arith.constant 0 : i32
    %c0_i32_0 = arith.constant 0 : i32
    %c0_i32_1 = arith.constant 0 : i32
    %c0_i32_2 = arith.constant 0 : i32
    return %arg0, %c0_i32, %c0_i32_0, %c0_i32_1 : i32, i32, i32, i32
  }
  func.func @transform_8(%arg0: i32) -> (i32, i32, i32, i32) {
    %c0_i32 = arith.constant 0 : i32
    %c0_i32_0 = arith.constant 0 : i32
    %c0_i32_1 = arith.constant 0 : i32
    %c0_i32_2 = arith.constant 0 : i32
    return %arg0, %c0_i32, %c0_i32_0, %c0_i32_1 : i32, i32, i32, i32
  }
  func.func @transform_9(%arg0: i32) -> (i32, i32, i32, i32) {
    %c0_i32 = arith.constant 0 : i32
    %c0_i32_0 = arith.constant 0 : i32
    %c0_i32_1 = arith.constant 0 : i32
    %c0_i32_2 = arith.constant 0 : i32
    return %arg0, %c0_i32, %c0_i32_0, %c0_i32_1 : i32, i32, i32, i32
  }
  func.func @transform_10(%arg0: i32) -> (i32, i32, i32, i32) {
    %c0_i32 = arith.constant 0 : i32
    %c0_i32_0 = arith.constant 0 : i32
    %c0_i32_1 = arith.constant 0 : i32
    %c0_i32_2 = arith.constant 0 : i32
    return %arg0, %c0_i32, %c0_i32_0, %c0_i32_1 : i32, i32, i32, i32
  }
  func.func @transform_11(%arg0: i32) -> (i32, i32, i32, i32) {
    %c0_i32 = arith.constant 0 : i32
    %c0_i32_0 = arith.constant 0 : i32
    %c0_i32_1 = arith.constant 0 : i32
    %c0_i32_2 = arith.constant 0 : i32
    return %arg0, %c0_i32, %c0_i32_0, %c0_i32_1 : i32, i32, i32, i32
  }
  func.func @transform_12(%arg0: i32) -> (i32, i32, i32, i32) {
    %c0_i32 = arith.constant 0 : i32
    %c0_i32_0 = arith.constant 0 : i32
    %c0_i32_1 = arith.constant 0 : i32
    %c0_i32_2 = arith.constant 0 : i32
    return %arg0, %c0_i32, %c0_i32_0, %c0_i32_1 : i32, i32, i32, i32
  }
  func.func @transform_13(%arg0: i32) -> (i32, i32, i32, i32) {
    %c0_i32 = arith.constant 0 : i32
    %c0_i32_0 = arith.constant 0 : i32
    %c0_i32_1 = arith.constant 0 : i32
    %c0_i32_2 = arith.constant 0 : i32
    return %arg0, %c0_i32, %c0_i32_0, %c0_i32_1 : i32, i32, i32, i32
  }
  func.func @transform_14(%arg0: i32) -> (i32, i32, i32, i32) {
    %c0_i32 = arith.constant 0 : i32
    %c0_i32_0 = arith.constant 0 : i32
    %c0_i32_1 = arith.constant 0 : i32
    %c0_i32_2 = arith.constant 0 : i32
    return %arg0, %c0_i32, %c0_i32_0, %c0_i32_1 : i32, i32, i32, i32
  }
  func.func @transform_15(%arg0: i32) -> (i32, i32, i32, i32) {
    %c0_i32 = arith.constant 0 : i32
    %c0_i32_0 = arith.constant 0 : i32
    %c0_i32_1 = arith.constant 0 : i32
    %c0_i32_2 = arith.constant 0 : i32
    return %arg0, %c0_i32, %c0_i32_0, %c0_i32_1 : i32, i32, i32, i32
  }
  func.func @transform_16(%arg0: i32) -> (i32, i32, i32) {
    %c0_i32 = arith.constant 0 : i32
    %c0_i32_0 = arith.constant 0 : i32
    %c0_i32_1 = arith.constant 0 : i32
    return %arg0, %c0_i32, %c0_i32_0 : i32, i32, i32
  }
  func.func @transform_17(%arg0: i32) -> (i32, i32, i32) {
    %c0_i32 = arith.constant 0 : i32
    %c0_i32_0 = arith.constant 0 : i32
    %c0_i32_1 = arith.constant 0 : i32
    return %arg0, %c0_i32, %c0_i32_0 : i32, i32, i32
  }
  func.func @transform_18(%arg0: i32) -> (i32, i32, i32) {
    %c0_i32 = arith.constant 0 : i32
    %c0_i32_0 = arith.constant 0 : i32
    %c0_i32_1 = arith.constant 0 : i32
    return %arg0, %c0_i32, %c0_i32_0 : i32, i32, i32
  }
}

</mosaic_0001>

<bundles_post_ra>
// kernel: mul.8
= control target key start
LH: loop header
LB: loop body
LE: loop exit
PB: predicated region body
PF: predicated region fallthrough
CT: control target
= control target key end

     0   :  { %vm7_vm0 = vcmask 64512   ;;  %vm13_vm1 = vcmask 130112   ;;  %s39_s0 = inlined_call_operand.vmem [shape: f32[2,8], index: 0, kind: input, shape index: {}]   ;;  %s40_s1 = inlined_call_operand.vmem [shape: f32[16], index: 1, kind: output, shape index: {}]  }
   0x1   :  { %v4_v0 = vld [vmem:[%s39_s0] sm:$0x3]  ;;  %s22_s0 = smov 8  }
   0x2   :  { %5 = vst [vmem:[#allocation1] sm:$0x3] %v4_v0 }
   0x9   :  { %v10_v1 = vld [vmem:[#allocation1 + $0x1] sm:$0x1]   ;;  %v6_v2 = vld [vmem:[#allocation1] sm:$0x1]  }
   0xa   :  { %11 = vrot.lane.b32.xlu0 %v10_v1, %s22_s0  ;;  %8 = vst.msk [vmem:[#allocation0] sm:$0x1] %vm7_vm0, %v6_v2  }
  0x7c   :  { %v12_v3 = vpop.permute.xlu0 %11  }
  0x7d   :  { %14 = vst.msk [vmem:[#allocation0] sm:$0x1] %vm13_vm1, %v12_v3  }
  0x84   :  { %v17_v4 = vld [vmem:[#allocation0] sm:$0x1] }
  0x85   :  { %20 = vst [vmem:[%s40_s1] sm:$0x1] %v17_v4 }

// kernel: retriever_encoder_forward_both.1
= control target key start
LH: loop header
LB: loop body
LE: loop exit
PB: predicated region body
PF: predicated region fallthrough
CT: control target
= control target key end

     0   :  { %s3540_s0 = inlined_call_operand.vmem [shape: f32[2,16,32], index: 0, kind: input, shape index: {}]   ;;  %s3541_s1 = inlined_call_operand.vmem [shape: f32[16,16], index: 1, kind: input, shape index: {}]   ;;  %s3542_s2 = inlined_call_operand.vmem [shape: f32[2,1,32], index: 2, kind: input, shape index: {}]   ;;  %s3543_s3 = inlined_call_operand.vmem [shape: f32[2,1,32], index: 3, kind: input, shape index: {}]   ;;  %s3544_s4 = inlined_call_operand.vmem [shape: bf16[2,2,32,96], index: 4, kind: input, shape index: {}]   ;;  %s3545_s5 = inlined_call_operand.vmem [shape: f32[2,2,1,96], index: 5, kind: input, shape index: {}]   ;;  %s3546_s6 = inlined_call_operand.vmem [shape: bf16[2,2,32,32], index: 6, kind: input, shape index: {}]   ;;  %s3547_s7 = inlined_call_operand.vmem [shape: f32[2,2,1,32], index: 7, kind: input, shape index: {}]   ;;  %s3548_s8 = inlined_call_operand.vmem [shape: f32[2,2,1,32], index: 8, kind: input, shape index: {}]   ;;  %s3549_s9 = inlined_call_operand.vmem [shape: f32[2,2,1,32], index: 9, kind: input, shape index: {}]   ;;  %s3550_s10 = inlined_call_operand.vmem [shape: bf16[2,2,32,64], index: 10, kind: input, shape index: {}]   ;;  %s3551_s11 = inlined_call_operand.vmem [shape: f32[2,2,1,64], index: 11, kind: input, shape index: {}]   ;;  %s3552_s12 = inlined_call_operand.vmem [shape: bf16[2,2,64,32], index: 12, kind: input, shape index: {}]   ;;  %s3553_s13 = inlined_call_operand.vmem [shape: f32[2,2,1,32], index: 13, kind: input, shape index: {}]   ;;  %s3554_s14 = inlined_call_operand.vmem [shape: f32[2,2,1,32], index: 14, kind: input, shape index: {}]   ;;  %s3555_s15 = inlined_call_operand.vmem [shape: f32[2,2,1,32], index: 15, kind: input, shape index: {}]   ;;  %s3556_s16 = inlined_call_operand.vmem [shape: bf16[2,32,32], index: 16, kind: input, shape index: {}]   ;;  %s3557_s17 = inlined_call_operand.vmem [shape: f32[2,1,32], index: 17, kind: input, shape index: {}]   ;;  %s3558_s18 = inlined_call_operand.hbm [shape: f32[2,2,32], index: 18, kind: output, shape index: {}]  }
   0x1   :  { %3583 = sst [smem:[#allocation13_spill]] %s3540_s0 }
   0x2   :  { %3584 = sst [smem:[#allocation14_spill]] %s3541_s1 }
   0x3   :  { %3585 = sst [smem:[#allocation15_spill]] %s3542_s2 }
   0x4   :  { %3586 = sst [smem:[#allocation16_spill]] %s3543_s3 }
   0x5   :  { %3587 = sst [smem:[#allocation17_spill]] %s3544_s4 }
   0x6   :  { %3588 = sst [smem:[#allocation18_spill]] %s3545_s5 }
   0x7   :  { %3589 = sst [smem:[#allocation19_spill]] %s3546_s6 }
   0x8   :  { %3590 = sst [smem:[#allocation20_spill]] %s3547_s7 }
   0x9   :  { %3591 = sst [smem:[#allocation21_spill]] %s3558_s18 }
   0xa   :  { %23 = vsyncpa [#allocation3], 0 }
   0xb   :  { %25 = vsyncpa [#allocation3 + $0x1], 0  ;;  %s3059_s27 = smov 0   ;;  %s3061_s28 = smov 0  }
   0xc   :  { %s3063_s29 = smov 0   ;;  %s3065_s30 = smov 0  }
   0xd LB: > { %3592 = sst [smem:[#allocation5_spill]] %s2938_s27  ;;  %s3080_s0 = sadd.s32 4294967295, %s2950_s30   ;;  %s2950_s30 = sphi %s3065_s30, %s3628_s30   ;;  %s2946_s29 = sphi %s3063_s29, %s3630_s29   ;;  %s2942_s28 = sphi %s3061_s28, %s3632_s28   ;;  %s2938_s27 = sphi %s3059_s27, %s3631_s27  }
   0xe   : > { %3593 = sst [smem:[#allocation6_spill]] %s2946_s29  ;;  %s2536_s19 = sadd.s32 4294967294, %s2950_s30  }
   0xf   : > { %3594 = sst [smem:[#allocation7_spill]] %s2950_s30  ;;  %s3084_s1 = sadd.s32 1, %s2950_s30  }
  0x10   : > { %3595 = sst [smem:[#allocation8_spill]] %s3080_s0  ;;  %s501_s20 = sadd.s32 1, %s2946_s29 }
  0x11   : > { %3596 = sst [smem:[#allocation9_spill]] %s3084_s1  ;;  %s498_s21 = ssub.s32 %s2950_s30, %s3084_s1 }
  0x12   : > { %p511_p0 = scmp.ne.s32.totalorder %s2946_s29, %s2942_s28  ;;  %p499_p1 = scmp.eq.s32.totalorder %s498_s21, 0 }
  0x13   : > { %p512_p2 = scmp.eq.s32.totalorder %s3080_s0, 1  ;;  %p517_p3 = scmp.ne.s32.totalorder %s2942_s28, %s2938_s27 }
  0x14   : > { %p518_p4 = scmp.eq.s32.totalorder %s2536_s19, 1  ;;  %p2539_p7 = scmp.ge.s32.totalorder %s2950_s30, 1 }
  0x15   : > { %s3095_s22 = scalar_select %p499_p1, %s2946_s29, %s501_s20  }
  0x16   : > { %p3097_p5 = por %p512_p2, %p511_p0  ;;  %p3101_p6 = por %p518_p4, %p517_p3 }
  0x17   : > { %3597 = sst [smem:[#allocation10_spill]] %s3095_s22  ;;  %p661_p8 = scmp.lt.s32.totalorder %s2950_s30, 3 }
  0x18   : > { %s3598_s2 = scalar_select %p3097_p5, 1, 0 }
  0x19   : > { %s3600_s23 = scalar_select %p3101_p6, 1, 0 }
  0x1a   : > { %3599 = sst [smem:[#allocation11_spill]] %s3598_s2  ;;  %p662_p9 = pnand %p2539_p7, %p661_p8 }
  0x1b   : > { %3601 = sst [smem:[#allocation12_spill]] %s3600_s23  ;;  %p781_p10 = scmp.lt.s32.totalorder (!%p662_p9), %s3080_s0, 1 }
  0x1c   : > { %665 = sbr.rel (%p662_p9) target bundleno = 5120 (0x1400), region = 92  ;;  %s3602_s20 = sld [smem:[#allocation13_spill]] (!%p662_p9) }
  0x1d   : > { %s3604_s3 = sld [smem:[#allocation16_spill]] (!%p662_p9)  ;;  %s3582_s23 = smov (!%p662_p9), 96  }
  0x1e   : > { %s3605_s5 = sld [smem:[#allocation18_spill]] (!%p662_p9)  ;;  %s3573_s27 = smov (!%p662_p9), 80  }
  0x1f   : > { %s3606_s4 = sld [smem:[#allocation17_spill]] (!%p662_p9)  ;;  %s3574_s22 = smov (!%p662_p9), 88  }
  0x20   : > { %s3607_s19 = sld [smem:[#allocation14_spill]] (!%p662_p9)  ;;  %s3578_s18 = smov (!%p662_p9), 104  }
  0x21   : > { %s3109_s24 = scalar_select %p781_p10, %s3080_s0, 1  ;;  %vm859_vm0 = vcmask 261120   ;;  %v2952_v4 = vmov 32.0   ;;  %vm963_vm8 = vcmask 64512   ;;  %vm988_vm9 = vcmask 130048  }
  0x22   : > { %2790 = vrcp.f32 %v2952_v4  ;;  %s3572_s0 = smov 64   ;;  %s3608_s6 = sld [smem:[#allocation19_spill]]  ;;  %vm1110_vm10 = vcmask 1043456  }
  0x23   : > { %s3561_s25 = sshll.u32 %s3109_s24, 4  ;;  %s791_s29 = scalar_lea.vmem %s3604_s3, %s3109_s24 }
  0x24   : > { %s785_s21 = scalar_lea.vmem %s3602_s20, %s3561_s25  ;;  %s3603_s20 = sld [smem:[#allocation15_spill]]  ;;  %v2772_v47 = vld [vmem:[%s791_s29] ss:$0 sm:$0xff] }
  0x25   : > { %v855_v0 = vld [vmem:[%s785_s21] sm:$0xff]  ;;  %v856_v2 = vld [vmem:[%s785_s21 + $0x8] sm:$0xff]  ;;  %s3134_s1 = sshll.u32 %s3109_s24, 1  ;;  %s3143_s2 = sshll.u32 %s3109_s24, 5 }
  0x26   : > { %v860_v1 = vsel %vm859_vm0, %v855_v0, 0.0  ;;  %v863_v3 = vsel %vm859_vm0, %v856_v2, 0.0  ;;  %s3140_s30 = scalar_lea.vmem %s3605_s5, %s3134_s1  ;;  %s3149_s26 = scalar_lea.vmem %s3606_s4, %s3143_s2  ;;  %v3183_v61 = vld [vmem:[%s3607_s19] sm:$0xff] }
  0x27   : > { %861 = vadd.xlane.f32.xlu0 %v860_v1  ;;  %v2703_v21 = vld [vmem:[%s3149_s26 + $0x8] sm:$0xff]  ;;  %v2702_v23 = vld [vmem:[%s3149_s26] sm:$0xff]  ;;  %s3581_s29 = smov 120   ;;  %s3580_s25 = smov 72  }
  0x28   : > { %v2791_v5 = vpop.eup %2790  ;;  %951 = vmatpush.bf16.msra.mxu0 %v2703_v21  ;;  %v2773_v53 = vld [vmem:[%s3140_s30] ss:$0 sm:$0xff]  ;;  %s3609_s7 = sld [smem:[#allocation20_spill]]  ;;  %s3309_s4 = scalar_lea.vmem %s3550_s10, %s3143_s2 }
  0x29   : > { %v867_v6 = vmul.f32 32.0, %v2791_v5  ;;  %vm871_vm1 = vweird.f32 %v2791_v5  ;;  %s3612_s5 = smov 80   ;;  %s3613_s3 = smov 72  }
  0x2a   : > { %s788_s21 = scalar_lea.vmem %s3603_s20, %s3109_s24 }
  0x2b   : > { %v868_v7 = vsub.f32 1.0, %v867_v6  ;;  %v2771_v42 = vld [vmem:[%s788_s21] ss:$0 sm:$0xff]  ;;  %s3579_s21 = smov 112  }
  0x2c   : > { %952 = vmatpush.bf16.msra.mxu0 %v2702_v23 }
  0x2d   : > { %v869_v8 = vmul.f32 %v2791_v5, %v868_v7 }
  0x2f   : > { %864 = vadd.xlane.f32.xlu0 %v863_v3  ;;  %v870_v9 = vadd.f32 %v2791_v5, %v869_v8 }
  0x31   : > { %v3119_v10 = vsel %vm871_vm1, %v2791_v5, %v870_v9 }
  0x9a   : > { %v862_v11 = vpop.xlane.xlu0 %861 }
  0x9b   : > { %v873_v12 = vmul.f32 %v3119_v10, %v862_v11 }
  0x9d   : > { %v875_v13 = vsub.f32 %v855_v0, %v873_v12 }
  0x9f   : > { %v877_v14 = vmul.f32 %v875_v13, %v875_v13 }
  0xa1   : > { %v879_v15 = vsel %vm859_vm0, %v877_v14, 0.0 }
  0xa2   : > { %880 = vadd.xlane.f32.xlu1 %v879_v15  ;;  %v865_v16 = vpop.xlane.xlu0 %864 }
  0xa3   : > { %v874_v17 = vmul.f32 %v3119_v10, %v865_v16 }
  0xa5   : > { %v876_v18 = vsub.f32 %v856_v2, %v874_v17  ;;  %v3190_v2 = vld [vmem:[%s3607_s19 + $0x8] sm:$0xff] }
  0xa7   : > { %v878_v19 = vmul.f32 %v876_v18, %v876_v18 }
  0xa9   : > { %v882_v20 = vsel %vm859_vm0, %v878_v19, 0.0 }
  0xaa   : > { %883 = vadd.xlane.f32.xlu1 %v882_v20 }
 0x115   : > { %v881_v22 = vpop.xlane.xlu1 %880 }
 0x116   : > { %v885_v24 = vmul.f32 %v881_v22, %v3119_v10 }
 0x118   : > { %v887_v25 = vadd.f32 1e-12, %v885_v24 }
 0x11a   : > { %2792 = vrsqrt.f32 %v887_v25  ;;  %vm895_vm3 = vweird.f32 %v887_v25 }
 0x11d   : > { %v884_v26 = vpop.xlane.xlu1 %883 }
 0x11e   : > { %v886_v27 = vmul.f32 %v884_v26, %v3119_v10 }
 0x120   : > { %v2793_v28 = vpop.eup %2792  ;;  %v888_v29 = vadd.f32 1e-12, %v886_v27 }
 0x121   : > { %v890_v30 = vmul.f32 %v2793_v28, %v887_v25  ;;  %vm896_vm2 = vweird.f32 %v2793_v28 }
 0x122   : > { %2794 = vrsqrt.f32 %v888_v29  ;;  %vm897_vm4 = vmor %vm895_vm3, %vm896_vm2  ;;  %vm905_vm6 = vweird.f32 %v888_v29  ;;  %vm1495_vm2 = vcmask 523264  }
 0x123   : > { %v891_v31 = vmul.f32 %v2793_v28, %v890_v30 }
 0x125   : > { %v892_v32 = vmul.f32 0.5, %v891_v31 }
 0x127   : > { %v893_v33 = vsub.f32 1.5, %v892_v32 }
 0x128   : > { %v2795_v34 = vpop.eup %2794 }
 0x129   : > { %v894_v35 = vmul.f32 %v2793_v28, %v893_v33  ;;  %v900_v36 = vmul.f32 %v2795_v34, %v888_v29  ;;  %vm906_vm5 = vweird.f32 %v2795_v34 }
 0x12a   : > { %vm907_vm7 = vmor %vm905_vm6, %vm906_vm5 }
 0x12b   : > { %v901_v37 = vmul.f32 %v2795_v34, %v900_v36  ;;  %v898_v38 = vsel %vm897_vm4, %v2793_v28, %v894_v35 }
 0x12c   : > { %v909_v41 = vmul.f32 %v898_v38, %v875_v13 }
 0x12d   : > { %v902_v39 = vmul.f32 0.5, %v901_v37 }
 0x12e   : > { %v914_v46 = vmul.f32 %v2771_v42, %v909_v41 }
 0x12f   : > { %v903_v40 = vsub.f32 1.5, %v902_v39 }
 0x130   : > { %v3165_v49 = vadd.f32 %v2772_v47, %v914_v46 }
 0x131   : > { %v904_v43 = vmul.f32 %v2795_v34, %v903_v40 }
 0x133   : > { %v908_v44 = vsel %vm907_vm7, %v2795_v34, %v904_v43 }
 0x134   : > { %v910_v45 = vmul.f32 %v908_v44, %v876_v18 }
 0x136   : > { %v915_v48 = vmul.f32 %v2771_v42, %v910_v45 }
 0x138   : > { %v3167_v50 = vadd.f32 %v2772_v47, %v915_v48 }
 0x13a   : > { %v925_v51 = vpack.c.bf16 %v3167_v50, %v3165_v49 }
 0x13c   : > { %2569 = vmatmul.msk.bf16.vlgmr.msra.gmra.mxu0 %vm859_vm0, %v925_v51 }
 0x1b9   : > { %v954_v52 = vpop.f32.mrf.mxu0 }
 0x1ba   : > { %v955_v55 = vadd.f32 %v2773_v53, %v954_v52 }
 0x1c1   : > { %v956_v54 = vpop.f32.mrf.mxu0 }
 0x1c2   : > { %v957_v56 = vadd.f32 %v2773_v53, %v956_v54 }
 0x1c4   : > { %v3173_v57 = vpack.c.bf16 %v957_v56, %v955_v55 }
 0x1c6   : > { %961 = vrot.lane.b32.xlu2 %v3173_v57, %s3582_s23  ;;  %s3292_s23 = scalar_lea.vmem %s3549_s9, %s3134_s1 }
 0x220   : > { %v962_v58 = vpop.permute.xlu2 %961 }
 0x221   : > { %v968_v59 = vsel %vm963_vm8, %v962_v58, 0 }
 0x222   : > { %977 = vmatpush.bf16.xpose.msra.mxu1 %v968_v59 }
 0x229   : > { %2570 = vmatmul.msk.bf16.vlgmr.msra.gmra.mxu1 %vm963_vm8, %v3173_v57 }
 0x2a6   : > { %v979_v60 = vpop.f32.mrf.mxu1 }
 0x2a7   : > { %v984_v62 = vmul.f32 0.35355338, %v979_v60 }
 0x2a9   : > { %v986_v63 = vadd.f32 %v984_v62, %v3183_v61 }
 0x2ab   : > { %v989_v0 = vsel %vm988_vm9, %v986_v63, -inf }
 0x2ac   : > { %990 = vmax.xlane.f32.xlu2 %v989_v0 }
 0x2ae   : > { %v981_v1 = vpop.f32.mrf.mxu1 }
 0x2af   : > { %v985_v3 = vmul.f32 0.35355338, %v981_v1 }
 0x2b1   : > { %v987_v4 = vadd.f32 %v985_v3, %v3190_v2 }
 0x2b3   : > { %v992_v5 = vsel %vm988_vm9, %v987_v4, -inf }
 0x2b4   : > { %993 = vmax.xlane.f32.xlu0 %v992_v5 }
 0x2c4   : > { %1150 = vrot.lane.b32.xlu2 %v3173_v57, %s3573_s27  ;;  %s3575_s27 = smov 56  }
 0x31f   : > { %v991_v6 = vpop.xlane.xlu2 %990 }
 0x320   : > { %v995_v7 = vsub.f32 %v986_v63, %v991_v6 }
 0x322   : > { %v997_v8 = vmul.f32 1.442695, %v995_v7 }
 0x324   : > { %2796 = vpow2.f32 %v997_v8 }
 0x327   : > { %v994_v9 = vpop.xlane.xlu0 %993  ;;  %v1151_v26 = vpop.permute.xlu2 %1150 }
 0x328   : > { %v996_v11 = vsub.f32 %v987_v4, %v994_v9  ;;  %v1156_v30 = vsel %vm963_vm8, %v1151_v26, 0 }
 0x32a   : > { %v2797_v12 = vpop.eup %2796  ;;  %v999_v13 = vmul.f32 1.442695, %v996_v11 }
 0x32b   : > { %v1001_v14 = vsel %vm988_vm9, %v2797_v12, 0.0 }
 0x32c   : > { %2798 = vpow2.f32 %v999_v13  ;;  %1002 = vadd.xlane.f32.xlu1 %v1001_v14 }
 0x332   : > { %v2799_v15 = vpop.eup %2798 }
 0x333   : > { %v1004_v16 = vsel %vm988_vm9, %v2799_v15, 0.0 }
 0x334   : > { %1005 = vadd.xlane.f32.xlu0 %v1004_v16 }
 0x345   : > { %1012 = vrot.lane.b32.xlu1 %v3173_v57, %s3572_s0  ;;  %s3576_s0 = smov 40  }
 0x348   : > { %1036 = vrot.lane.b32.xlu0 %v3173_v57, %s3574_s22  ;;  %s3214_s22 = scalar_lea.vmem %s3608_s6, %s3143_s2  ;;  %s3342_s2 = scalar_lea.vmem %s3554_s14, %s3134_s1 }
 0x349   : > { %v1032_v17 = vld [vmem:[%s3214_s22] sm:$0xf] }
 0x34a   : > { %v1132_v18 = vsel %vm1110_vm10, %v1032_v17, 0 }
 0x34b   : > { %1141 = vmatpush.bf16.msrb.mxu1 %v1132_v18 }
 0x34d   : > { %1034 = vrot.lane.b32.xlu1 %v3173_v57, %s3581_s29  ;;  %s3322_s29 = scalar_lea.vmem %s3553_s13, %s3134_s1 }
 0x350   : > { %1245 = vrot.lane.b32.xlu0 %v3173_v57, %s3580_s25  ;;  %s2700_s25 = sshll.u32 %s3109_s24, 6 }
 0x351   : > { %s3328_s6 = scalar_lea.vmem %s3552_s12, %s2700_s25  ;;  %s3615_s25 = smov 112  }
 0x355   : > { %1148 = vrot.lane.b32.xlu1 %v3173_v57, %s3579_s21  ;;  %s3286_s21 = scalar_lea.vmem %s3548_s8, %s3134_s1 }
 0x358   : > { %1243 = vrot.lane.b32.xlu0 %v3173_v57, %s3578_s18  ;;  %s3274_s18 = scalar_lea.vmem %s3609_s7, %s3134_s1  ;;  %s3348_s7 = scalar_lea.vmem %s3555_s15, %s3134_s1 }
 0x39f   : > { %v1003_v20 = vpop.xlane.xlu1 %1002 }
 0x3a7   : > { %v1006_v19 = vpop.xlane.xlu0 %1005 }
 0x3a8   : > { %2800 = vrcp.f32 %v1006_v19 }
 0x3a9   : > { %2802 = vrcp.f32 %v1003_v20 }
 0x3ae   : > { %v2801_v21 = vpop.eup %2800 }
 0x3af   : > { %v2803_v22 = vpop.eup %2802  ;;  %v1010_v23 = vmul.f32 %v2801_v21, %v2799_v15 }
 0x3b0   : > { %v1009_v25 = vmul.f32 %v2803_v22, %v2797_v12 }
 0x3b2   : > { %v1011_v27 = vpack.c.bf16 %v1010_v23, %v1009_v25 }
 0x3b7   : > { %v1013_v24 = vpop.permute.xlu1 %1012 }
 0x3b8   : > { %1025 = vmatpush.bf16.msra.mxu2 %v1013_v24 }
 0x3ba   : > { %v1037_v28 = vpop.permute.xlu0 %1036 }
 0x3bb   : > { %2571 = vmatmul.msk.bf16.vlgmr.msra.gmra.mxu2 %vm988_vm9, %v1011_v27  ;;  %v1042_v29 = vsel %vm963_vm8, %v1037_v28, 0 }
 0x3bc   : > { %1051 = vmatpush.bf16.xpose.msra.mxu3 %v1042_v29 }
 0x3bf   : > { %v1035_v31 = vpop.permute.xlu1 %1034 }
 0x3c2   : > { %v1246_v32 = vpop.permute.xlu0 %1245 }
 0x3c3   : > { %v1251_v33 = vsel %vm963_vm8, %v1246_v32, 0  ;;  %2572 = vmatmul.msk.bf16.vlgmr.msra.gmra.mxu3 %vm963_vm8, %v1035_v31 }
 0x3c4   : > { %1165 = vmatpush.bf16.xpose.msrb.mxu3 %v1156_v30  ;;  %1260 = vmatpush.bf16.xpose.msra.mxu1 %v1251_v33 }
 0x3c7   : > { %v1149_v34 = vpop.permute.xlu1 %1148 }
 0x3ca   : > { %v1244_v48 = vpop.permute.xlu0 %1243 }
 0x3d3   : > { %2576 = vmatmul.msk.bf16.vlgmr.msrb.gmra.mxu3 %vm963_vm8, %v1149_v34 }
 0x43e   : > { %v1027_v35 = vpop.f32.mrf.mxu2 }
 0x446   : > { %v1029_v36 = vpop.f32.mrf.mxu2  ;;  %v1053_v37 = vpop.f32.mrf.mxu3 }
 0x447   : > { %v1033_v38 = vpack.c.bf16 %v1029_v36, %v1027_v35  ;;  %v1058_v39 = vmul.f32 0.35355338, %v1053_v37 }
 0x449   : > { %2575 = vmatmul.msk.bf16.vlgmr.msrb.gmra.mxu1 %vm963_vm8, %v1033_v38  ;;  %v1060_v40 = vadd.f32 %v1058_v39, %v3183_v61 }
 0x44b   : > { %v1062_v41 = vsel %vm988_vm9, %v1060_v40, -inf }
 0x44c   : > { %1063 = vmax.xlane.f32.xlu1 %v1062_v41 }
 0x44e   : > { %v1055_v42 = vpop.f32.mrf.mxu3 }
 0x44f   : > { %v1059_v43 = vmul.f32 0.35355338, %v1055_v42 }
 0x451   : > { %v1061_v44 = vadd.f32 %v1059_v43, %v3190_v2 }
 0x453   : > { %v1065_v45 = vsel %vm988_vm9, %v1061_v44, -inf }
 0x454   : > { %1066 = vmax.xlane.f32.xlu0 %v1065_v45 }
 0x456   : > { %v1167_v46 = vpop.f32.mrf.mxu3 }
 0x457   : > { %v1172_v47 = vmul.f32 0.35355338, %v1167_v46  ;;  %v1105_v46 = vld [vmem:[%s3214_s22 + $0x4] sm:$0xf] }
 0x459   : > { %2579 = vmatmul.msk.bf16.vlgmr.msra.gmra.mxu1 %vm963_vm8, %v1244_v48  ;;  %v1174_v51 = vadd.f32 %v1172_v47, %v3183_v61  ;;  %v1112_v47 = vsel %vm1110_vm10, %v1105_v46, 0 }
 0x45a   : > { %1121 = vmatpush.bf16.msrb.mxu0 %v1112_v47 }
 0x45b   : > { %v1176_v52 = vsel %vm988_vm9, %v1174_v51, -inf }
 0x45c   : > { %1177 = vmax.xlane.f32.xlu0 %v1176_v52 }
 0x45e   : > { %v1169_v1 = vpop.f32.mrf.mxu3 }
 0x45f   : > { %v1173_v5 = vmul.f32 0.35355338, %v1169_v1 }
 0x461   : > { %v1175_v12 = vadd.f32 %v1173_v5, %v3190_v2 }
 0x463   : > { %v1179_v15 = vsel %vm988_vm9, %v1175_v12, -inf }
 0x4bf   : > { %v1064_v63 = vpop.xlane.xlu1 %1063 }
 0x4c0   : > { %v1068_v4 = vsub.f32 %v1060_v40, %v1064_v63 }
 0x4c2   : > { %v1070_v7 = vmul.f32 1.442695, %v1068_v4 }
 0x4c6   : > { %v3232_v53 = vpop.f32.mrf.mxu1 }
 0x4c7   : > { %v1067_v54 = vpop.xlane.xlu0 %1066 }
 0x4c8   : > { %v1069_v55 = vsub.f32 %v1061_v44, %v1067_v54 }
 0x4ca   : > { %v1072_v56 = vmul.f32 1.442695, %v1069_v55 }
 0x4cc   : > { %2804 = vpow2.f32 %v1072_v56 }
 0x4cd   : > { %2806 = vpow2.f32 %v1070_v7 }
 0x4ce   : > { %v3234_v58 = vpop.f32.mrf.mxu1 }
 0x4cf   : > { %v1178_v9 = vpop.xlane.xlu0 %1177 }
 0x4d0   : > { %v1182_v14 = vsub.f32 %v1174_v51, %v1178_v9 }
 0x4d2   : > { %v2805_v59 = vpop.eup %2804  ;;  %v1184_v17 = vmul.f32 1.442695, %v1182_v14 }
 0x4d3   : > { %v1077_v60 = vsel %vm988_vm9, %v2805_v59, 0.0  ;;  %v2807_v18 = vpop.eup %2806 }
 0x4d4   : > { %1078 = vadd.xlane.f32.xlu0 %v1077_v60  ;;  %2808 = vpow2.f32 %v1184_v17  ;;  %v1074_v19 = vsel %vm988_vm9, %v2807_v18, 0.0 }
 0x4d6   : > { %v1262_v62 = vpop.f32.mrf.mxu1 }
 0x4d7   : > { %v1267_v0 = vmul.f32 0.35355338, %v1262_v62 }
 0x4d9   : > { %v1269_v3 = vadd.f32 %v1267_v0, %v3183_v61 }
 0x4da   : > { %v3244_v20 = vpop.eup %2808 }
 0x4db   : > { %v1271_v6 = vsel %vm988_vm9, %v1269_v3, -inf  ;;  %v1188_v21 = vsel %vm988_vm9, %v3244_v20, 0.0 }
 0x4dc   : > { %1272 = vmax.xlane.f32.xlu2 %v1271_v6 }
 0x4de   : > { %v1264_v8 = vpop.f32.mrf.mxu1 }
 0x4df   : > { %v1268_v11 = vmul.f32 0.35355338, %v1264_v8  ;;  %v1314_v8 = vld [vmem:[%s3214_s22 + $0xc] sm:$0xf] }
 0x4e0   : > { %v1320_v9 = vsel %vm1110_vm10, %v1314_v8, 0 }
 0x4e1   : > { %v1270_v13 = vadd.f32 %v1268_v11, %v3190_v2  ;;  %v1219_v11 = vld [vmem:[%s3214_s22 + $0x8] sm:$0xf] }
 0x4e3   : > { %v1274_v16 = vsel %vm988_vm9, %v1270_v13, -inf }
 0x4e4   : > { %1180 = vmax.xlane.f32.xlu2 %v1179_v15  ;;  %1275 = vmax.xlane.f32.xlu1 %v1274_v16 }
 0x4ec   : > { %1075 = vadd.xlane.f32.xlu1 %v1074_v19 }
 0x4f4   : > { %1189 = vadd.xlane.f32.xlu1 %v1188_v21 }
 0x4fc   : > { %1085 = vrot.lane.b32.xlu2 %v3173_v57, %s3575_s27  ;;  %s3577_s27 = smov 48  }
 0x547   : > { %v1079_v31 = vpop.xlane.xlu0 %1078 }
 0x54f   : > { %v1273_v22 = vpop.xlane.xlu2 %1272 }
 0x550   : > { %v1277_v23 = vsub.f32 %v1269_v3, %v1273_v22 }
 0x552   : > { %v1279_v24 = vmul.f32 1.442695, %v1277_v23 }
 0x554   : > { %2810 = vpow2.f32 %v1279_v24 }
 0x557   : > { %v1181_v25 = vpop.xlane.xlu2 %1180  ;;  %v1276_v26 = vpop.xlane.xlu1 %1275 }
 0x558   : > { %v1183_v27 = vsub.f32 %v1175_v12, %v1181_v25  ;;  %v1278_v30 = vsub.f32 %v1270_v13, %v1276_v26  ;;  %v1225_v12 = vsel %vm1110_vm10, %v1219_v11, 0  ;;  %v2774_v26 = vld [vmem:[%s3274_s18] ss:$0 sm:$0xff] }
 0x559   : > { %1234 = vmatpush.bf16.msra.mxu0 %v1225_v12  ;;  %v2776_v11 = vld [vmem:[%s3292_s23] ss:$0 sm:$0xff] }
 0x55a   : > { %v2811_v28 = vpop.eup %2810  ;;  %v1186_v29 = vmul.f32 1.442695, %v1183_v27  ;;  %v1281_v33 = vmul.f32 1.442695, %v1278_v30 }
 0x55b   : > { %v1283_v32 = vsel %vm988_vm9, %v2811_v28, 0.0 }
 0x55c   : > { %2812 = vpow2.f32 %v1186_v29  ;;  %1284 = vadd.xlane.f32.xlu1 %v1283_v32 }
 0x55d   : > { %2814 = vrcp.f32 %v1079_v31 }
 0x55f   : > { %v1086_v34 = vpop.permute.xlu2 %1085  ;;  %v1076_v35 = vpop.xlane.xlu1 %1075 }
 0x560   : > { %2816 = vrcp.f32 %v1076_v35  ;;  %1098 = vmatpush.bf16.msrb.mxu2 %v1086_v34 }
 0x561   : > { %2818 = vpow2.f32 %v1281_v33 }
 0x562   : > { %v2813_v36 = vpop.eup %2812 }
 0x563   : > { %v1191_v37 = vsel %vm988_vm9, %v2813_v36, 0.0  ;;  %v2815_v38 = vpop.eup %2814 }
 0x564   : > { %1192 = vadd.xlane.f32.xlu0 %v1191_v37  ;;  %v1083_v40 = vmul.f32 %v2815_v38, %v2805_v59 }
 0x566   : > { %v2817_v39 = vpop.eup %2816 }
 0x567   : > { %v1082_v41 = vmul.f32 %v2817_v39, %v2807_v18  ;;  %v2819_v42 = vpop.eup %2818  ;;  %v1190_v45 = vpop.xlane.xlu1 %1189 }
 0x568   : > { %v1286_v44 = vsel %vm988_vm9, %v2819_v42, 0.0 }
 0x569   : > { %v1084_v43 = vpack.c.bf16 %v1083_v40, %v1082_v41 }
 0x56b   : > { %2573 = vmatmul.msk.bf16.vlgmr.msrb.gmra.mxu2 %vm988_vm9, %v1084_v43 }
 0x56c   : > { %1287 = vadd.xlane.f32.xlu0 %v1286_v44  ;;  %v2705_v44 = vld [vmem:[%s3309_s4 + $0x8] sm:$0xff] }
 0x575   : > { %1294 = vrot.lane.b32.xlu1 %v3173_v57, %s3576_s0  ;;  %s3616_s0 = smov 88  }
 0x580   : > { %1199 = vrot.lane.b32.xlu0 %v3173_v57, %s3577_s27  ;;  %s3303_s27 = scalar_lea.vmem %s3551_s11, %s3134_s1  ;;  %s3610_s1 = smov 96  }
 0x5cf   : > { %v1285_v51 = vpop.xlane.xlu1 %1284 }
 0x5d0   : > { %2820 = vrcp.f32 %v1285_v51 }
 0x5d6   : > { %v2821_v54 = vpop.eup %2820 }
 0x5d7   : > { %v1193_v48 = vpop.xlane.xlu0 %1192  ;;  %v1291_v56 = vmul.f32 %v2821_v54, %v2811_v28 }
 0x5df   : > { %v1288_v52 = vpop.xlane.xlu0 %1287 }
 0x5e0   : > { %2822 = vrcp.f32 %v1288_v52 }
 0x5e1   : > { %2824 = vrcp.f32 %v1193_v48  ;;  %v2704_v48 = vld [vmem:[%s3309_s4] sm:$0xff] }
 0x5e2   : > { %2826 = vrcp.f32 %v1190_v45 }
 0x5e6   : > { %v2823_v55 = vpop.eup %2822 }
 0x5e7   : > { %v1292_v59 = vmul.f32 %v2823_v55, %v2819_v42  ;;  %v1295_v60 = vpop.permute.xlu1 %1294  ;;  %v2825_v62 = vpop.eup %2824 }
 0x5e8   : > { %1307 = vmatpush.bf16.msra.mxu3 %v1295_v60  ;;  %v2827_v0 = vpop.eup %2826  ;;  %v1197_v1 = vmul.f32 %v2825_v62, %v2813_v36 }
 0x5e9   : > { %v1293_v57 = vpack.c.bf16 %v1292_v59, %v1291_v56  ;;  %v1196_v3 = vmul.f32 %v2827_v0, %v3244_v20 }
 0x5eb   : > { %2580 = vmatmul.msk.bf16.vlgmr.msra.gmra.mxu3 %vm988_vm9, %v1293_v57  ;;  %v1198_v5 = vpack.c.bf16 %v1197_v1, %v1196_v3 }
 0x5ee   : > { %v1100_v63 = vpop.f32.mrf.mxu2 }
 0x5f2   : > { %v1200_v4 = vpop.permute.xlu0 %1199 }
 0x5f3   : > { %1212 = vmatpush.bf16.msra.mxu2 %v1200_v4 }
 0x5f6   : > { %v1102_v6 = vpop.f32.mrf.mxu2  ;;  %2577 = vmatmul.msk.bf16.vlgmr.msra.gmra.mxu2 %vm988_vm9, %v1198_v5 }
 0x5f7   : > { %v1106_v7 = vpack.c.bf16 %v1102_v6, %v1100_v63  ;;  %1329 = vmatpush.bf16.msrb.mxu2 %v1320_v9  ;;  %v2775_v6 = vld [vmem:[%s3286_s21] ss:$0 sm:$0xff] }
 0x5f9   : > { %2574 = vmatmul.msk.bf16.vlgmr.msrb.gmra.mxu0 %vm963_vm8, %v1106_v7 }
 0x5fa   : > { %1432 = vmatpush.bf16.msrb.mxu0 %v2705_v44 }
 0x5fe   : > { %1433 = vmatpush.bf16.msrb.mxu0 %v2704_v48 }
 0x66e   : > { %v1309_v13 = vpop.f32.mrf.mxu3 }
 0x676   : > { %v1311_v14 = vpop.f32.mrf.mxu3  ;;  %v1123_v19 = vpop.f32.mrf.mxu0 }
 0x677   : > { %v1315_v15 = vpack.c.bf16 %v1311_v14, %v1309_v13  ;;  %v1144_v21 = vadd.f32 %v3232_v53, %v1123_v19  ;;  %v2708_v19 = vld [vmem:[%s3328_s6 + $0x10] sm:$0xff] }
 0x679   : > { %v1214_v16 = vpop.f32.mrf.mxu2  ;;  %2581 = vmatmul.msk.bf16.vlgmr.msrb.gmra.mxu2 %vm963_vm8, %v1315_v15 }
 0x67e   : > { %v1125_v20 = vpop.f32.mrf.mxu0 }
 0x67f   : > { %v1146_v28 = vadd.f32 %v3234_v58, %v1125_v20  ;;  %v2707_v20 = vld [vmem:[%s3328_s6 + $0x8] sm:$0xff] }
 0x681   : > { %v1216_v17 = vpop.f32.mrf.mxu2 }
 0x682   : > { %v1220_v18 = vpack.c.bf16 %v1216_v17, %v1214_v16 }
 0x684   : > { %2578 = vmatmul.msk.bf16.vlgmr.msra.gmra.mxu0 %vm963_vm8, %v1220_v18  ;;  %v2709_v18 = vld [vmem:[%s3328_s6 + $0x18] sm:$0xff] }
 0x685   : > { %1503 = vmatpush.bf16.msrb.mxu1 %v2709_v18 }
 0x689   : > { %1504 = vmatpush.bf16.msrb.mxu1 %v2708_v19 }
 0x68d   : > { %1505 = vmatpush.bf16.msrb.mxu1 %v2707_v20 }
 0x6fc   : > { %v1331_v22 = vpop.f32.mrf.mxu2 }
 0x701   : > { %v1236_v23 = vpop.f32.mrf.mxu0 }
 0x702   : > { %v1241_v24 = vadd.f32 %v1236_v23, %v1144_v21  ;;  %v2706_v21 = vld [vmem:[%s3328_s6] sm:$0xff] }
 0x703   : > { %1506 = vmatpush.bf16.msrb.mxu1 %v2706_v21 }
 0x704   : > { %v1336_v25 = vadd.f32 %v1331_v22, %v1241_v24  ;;  %v1333_v33 = vpop.f32.mrf.mxu2  ;;  %v2777_v22 = vld [vmem:[%s3303_s27] ss:$0 sm:$0xff] }
 0x706   : > { %v1338_v27 = vadd.f32 %v1336_v25, %v3165_v49 }
 0x708   : > { %v1344_v29 = vadd.f32 %v2774_v26, %v1338_v27 }
 0x709   : > { %v1238_v30 = vpop.f32.mrf.mxu0 }
 0x70a   : > { %v1242_v31 = vadd.f32 %v1238_v30, %v1146_v28  ;;  %v1348_v32 = vsel %vm859_vm0, %v1344_v29, 0.0 }
 0x70b   : > { %1349 = vadd.xlane.f32.xlu2 %v1348_v32 }
 0x70c   : > { %v1337_v34 = vadd.f32 %v1333_v33, %v1242_v31 }
 0x70e   : > { %v1339_v53 = vadd.f32 %v1337_v34, %v3167_v50 }
 0x710   : > { %v1345_v49 = vadd.f32 %v2774_v26, %v1339_v53 }
 0x712   : > { %v1351_v58 = vsel %vm859_vm0, %v1345_v49, 0.0 }
 0x713   : > { %1352 = vadd.xlane.f32.xlu0 %v1351_v58 }
 0x77e   : > { %v1350_v35 = vpop.xlane.xlu2 %1349 }
 0x77f   : > { %v1354_v36 = vmul.f32 %v1350_v35, %v3119_v10 }
 0x781   : > { %v1356_v50 = vsub.f32 %v1344_v29, %v1354_v36 }
 0x783   : > { %v1358_v37 = vmul.f32 %v1356_v50, %v1356_v50 }
 0x785   : > { %v1360_v38 = vsel %vm859_vm0, %v1358_v37, 0.0 }
 0x786   : > { %1361 = vadd.xlane.f32.xlu1 %v1360_v38  ;;  %v1353_v39 = vpop.xlane.xlu0 %1352 }
 0x787   : > { %v1355_v40 = vmul.f32 %v1353_v39, %v3119_v10 }
 0x789   : > { %v1357_v41 = vsub.f32 %v1345_v49, %v1355_v40 }
 0x78b   : > { %v1359_v42 = vmul.f32 %v1357_v41, %v1357_v41 }
 0x78d   : > { %v1363_v43 = vsel %vm859_vm0, %v1359_v42, 0.0  ;;  %v2778_v42 = vld [vmem:[%s3322_s29] ss:$0 sm:$0xff] }
 0x78e   : > { %1364 = vadd.xlane.f32.xlu2 %v1363_v43 }
 0x7f9   : > { %v1362_v45 = vpop.xlane.xlu1 %1361 }
 0x7fa   : > { %v1366_v46 = vmul.f32 %v1362_v45, %v3119_v10 }
 0x7fc   : > { %v1368_v47 = vadd.f32 1e-12, %v1366_v46 }
 0x7fe   : > { %2828 = vrsqrt.f32 %v1368_v47  ;;  %vm1376_vm12 = vweird.f32 %v1368_v47 }
 0x801   : > { %v1365_v51 = vpop.xlane.xlu2 %1364 }
 0x802   : > { %v1367_v52 = vmul.f32 %v1365_v51, %v3119_v10 }
 0x804   : > { %v2829_v54 = vpop.eup %2828  ;;  %v1369_v55 = vadd.f32 1e-12, %v1367_v52 }
 0x805   : > { %v1371_v56 = vmul.f32 %v2829_v54, %v1368_v47  ;;  %vm1377_vm11 = vweird.f32 %v2829_v54 }
 0x806   : > { %2830 = vrsqrt.f32 %v1369_v55  ;;  %vm1378_vm13 = vmor %vm1376_vm12, %vm1377_vm11  ;;  %vm1386_vm15 = vweird.f32 %v1369_v55 }
 0x807   : > { %v1372_v59 = vmul.f32 %v2829_v54, %v1371_v56 }
 0x809   : > { %v1373_v60 = vmul.f32 0.5, %v1372_v59 }
 0x80b   : > { %v1374_v57 = vsub.f32 1.5, %v1373_v60 }
 0x80c   : > { %v2831_v62 = vpop.eup %2830 }
 0x80d   : > { %v1375_v63 = vmul.f32 %v2829_v54, %v1374_v57  ;;  %v1381_v0 = vmul.f32 %v2831_v62, %v1369_v55  ;;  %vm1387_vm14 = vweird.f32 %v2831_v62 }
 0x80e   : > { %vm1388_vm1 = vmor %vm1386_vm15, %vm1387_vm14 }
 0x80f   : > { %v1382_v1 = vmul.f32 %v2831_v62, %v1381_v0  ;;  %v1379_v3 = vsel %vm1378_vm13, %v2829_v54, %v1375_v63 }
 0x810   : > { %v1390_v7 = vmul.f32 %v1379_v3, %v1356_v50  ;;  %v2711_v3 = vld [vmem:[%s3149_s26 + $0x18] sm:$0xff] }
 0x811   : > { %v1383_v4 = vmul.f32 0.5, %v1382_v1  ;;  %1603 = vmatpush.bf16.msrb.mxu3 %v2711_v3 }
 0x812   : > { %v1395_v12 = vmul.f32 %v2775_v6, %v1390_v7  ;;  %v2710_v7 = vld [vmem:[%s3149_s26 + $0x10] sm:$0xff]  ;;  %s3611_s26 = smov 120  }
 0x813   : > { %v1384_v5 = vsub.f32 1.5, %v1383_v4 }
 0x814   : > { %v1400_v15 = vadd.f32 %v2776_v11, %v1395_v12 }
 0x815   : > { %v1385_v8 = vmul.f32 %v2831_v62, %v1384_v5  ;;  %1604 = vmatpush.bf16.msrb.mxu3 %v2710_v7 }
 0x817   : > { %v1389_v9 = vsel %vm1388_vm1, %v2831_v62, %v1385_v8 }
 0x818   : > { %v1391_v13 = vmul.f32 %v1389_v9, %v1357_v41 }
 0x81a   : > { %v1396_v14 = vmul.f32 %v2775_v6, %v1391_v13 }
 0x81c   : > { %v1401_v16 = vadd.f32 %v2776_v11, %v1396_v14 }
 0x81e   : > { %v1406_v17 = vpack.c.bf16 %v1401_v16, %v1400_v15 }
 0x820   : > { %2590 = vmatmul.msk.bf16.vlgmr.msrb.gmra.mxu0 %vm859_vm0, %v1406_v17 }
 0x89d   : > { %v1435_v23 = vpop.f32.mrf.mxu0 }
 0x89e   : > { %v1436_v24 = vadd.f32 %v2777_v22, %v1435_v23 }
 0x8a0   : > { %v1442_v25 = vmul.f32 0.044715, %v1436_v24  ;;  %v1440_v50 = vmul.f32 0.5, %v1436_v24 }
 0x8a2   : > { %v1444_v26 = vmul.f32 %v1442_v25, %v1436_v24 }
 0x8a4   : > { %v1446_v27 = vmul.f32 %v1444_v26, %v1436_v24 }
 0x8a5   : > { %v1437_v28 = vpop.f32.mrf.mxu0 }
 0x8a6   : > { %v1448_v29 = vadd.f32 %v1446_v27, %v1436_v24  ;;  %v1438_v30 = vadd.f32 %v2777_v22, %v1437_v28  ;;  %v2779_v24 = vld [vmem:[%s3342_s2] ss:$0 sm:$0xff] }
 0x8a7   : > { %v2780_v28 = vld [vmem:[%s3348_s7] ss:$0 sm:$0xff] }
 0x8a8   : > { %v1443_v31 = vmul.f32 0.044715, %v1438_v30  ;;  %v1450_v32 = vmul.f32 0.7978846, %v1448_v29  ;;  %v1441_v37 = vmul.f32 0.5, %v1438_v30 }
 0x8aa   : > { %v1445_v33 = vmul.f32 %v1443_v31, %v1438_v30  ;;  %2832 = vtanh.f32 %v1450_v32 }
 0x8ac   : > { %v1447_v34 = vmul.f32 %v1445_v33, %v1438_v30 }
 0x8ae   : > { %v1449_v53 = vadd.f32 %v1447_v34, %v1438_v30 }
 0x8b0   : > { %v1451_v49 = vmul.f32 0.7978846, %v1449_v53  ;;  %v2833_v58 = vpop.eup %2832 }
 0x8b1   : > { %v1454_v35 = vadd.f32 1.0, %v2833_v58 }
 0x8b2   : > { %2834 = vtanh.f32 %v1451_v49  ;;  %v2781_v49 = vld [vmem:[%s3140_s30 + $0x1] ss:$0 sm:$0xff]  ;;  %s3614_s30 = smov 64  }
 0x8b3   : > { %v1456_v39 = vmul.f32 %v1454_v35, %v1440_v50 }
 0x8b8   : > { %v2835_v36 = vpop.eup %2834 }
 0x8b9   : > { %v1455_v38 = vadd.f32 1.0, %v2835_v36 }
 0x8bb   : > { %v1457_v40 = vmul.f32 %v1455_v38, %v1441_v37 }
 0x8bd   : > { %v1466_v41 = vpack.c.bf16 %v1457_v40, %v1456_v39 }
 0x8bf   : > { %2607 = vmatmul.msk.bf16.vlgmr.msrb.gmra.mxu1 %vm1495_vm2, %v1466_v41 }
 0x93c   : > { %v1508_v43 = vpop.f32.mrf.mxu1 }
 0x93d   : > { %v1509_v44 = vadd.f32 %v2778_v42, %v1508_v43 }
 0x93f   : > { %v1513_v45 = vadd.f32 %v1509_v44, %v1400_v15 }
 0x941   : > { %v1517_v46 = vsel %vm859_vm0, %v1513_v45, 0.0 }
 0x942   : > { %1518 = vadd.xlane.f32.xlu2 %v1517_v46 }
 0x944   : > { %v1510_v47 = vpop.f32.mrf.mxu1 }
 0x945   : > { %v1511_v48 = vadd.f32 %v2778_v42, %v1510_v47 }
 0x947   : > { %v1514_v51 = vadd.f32 %v1511_v48, %v1401_v16 }
 0x949   : > { %v1520_v52 = vsel %vm859_vm0, %v1514_v51, 0.0 }
 0x94a   : > { %1521 = vadd.xlane.f32.xlu2 %v1520_v52 }
 0x9b5   : > { %v1519_v54 = vpop.xlane.xlu2 %1518 }
 0x9b6   : > { %v1523_v55 = vmul.f32 %v1519_v54, %v3119_v10 }
 0x9b8   : > { %v1525_v56 = vsub.f32 %v1513_v45, %v1523_v55 }
 0x9ba   : > { %v1527_v59 = vmul.f32 %v1525_v56, %v1525_v56 }
 0x9bc   : > { %v1529_v60 = vsel %vm859_vm0, %v1527_v59, 0.0 }
 0x9bd   : > { %1530 = vadd.xlane.f32.xlu0 %v1529_v60  ;;  %v1522_v57 = vpop.xlane.xlu2 %1521 }
 0x9be   : > { %v1524_v62 = vmul.f32 %v1522_v57, %v3119_v10 }
 0x9c0   : > { %v1526_v63 = vsub.f32 %v1514_v51, %v1524_v62 }
 0x9c2   : > { %v1528_v0 = vmul.f32 %v1526_v63, %v1526_v63 }
 0x9c4   : > { %v1532_v1 = vsel %vm859_vm0, %v1528_v0, 0.0 }
 0x9c5   : > { %1533 = vadd.xlane.f32.xlu1 %v1532_v1 }
 0xa30   : > { %v1531_v4 = vpop.xlane.xlu0 %1530 }
 0xa31   : > { %v1535_v5 = vmul.f32 %v1531_v4, %v3119_v10  ;;  %v2624_v4 = vld [vmem:[%s3214_s22 + $0x10] sm:$0xf] }
 0xa32   : > { %v1782_v7 = vsel %vm1110_vm10, %v2624_v4, 0 }
 0xa33   : > { %v1537_v6 = vadd.f32 1e-12, %v1535_v5 }
 0xa35   : > { %2836 = vrsqrt.f32 %v1537_v6  ;;  %vm1545_vm4 = vweird.f32 %v1537_v6 }
 0xa38   : > { %v1534_v8 = vpop.xlane.xlu1 %1533 }
 0xa39   : > { %v1536_v9 = vmul.f32 %v1534_v8, %v3119_v10 }
 0xa3b   : > { %v2837_v11 = vpop.eup %2836  ;;  %v1538_v12 = vadd.f32 1e-12, %v1536_v9 }
 0xa3c   : > { %v1540_v13 = vmul.f32 %v2837_v11, %v1537_v6  ;;  %vm1546_vm3 = vweird.f32 %v2837_v11 }
 0xa3d   : > { %2838 = vrsqrt.f32 %v1538_v12  ;;  %vm1547_vm5 = vmor %vm1545_vm4, %vm1546_vm3  ;;  %vm1555_vm7 = vweird.f32 %v1538_v12 }
 0xa3e   : > { %v1541_v14 = vmul.f32 %v2837_v11, %v1540_v13 }
 0xa40   : > { %v1542_v15 = vmul.f32 0.5, %v1541_v14 }
 0xa42   : > { %v1543_v16 = vsub.f32 1.5, %v1542_v15 }
 0xa43   : > { %v2839_v17 = vpop.eup %2838 }
 0xa44   : > { %v1544_v18 = vmul.f32 %v2837_v11, %v1543_v16  ;;  %v1550_v19 = vmul.f32 %v2839_v17, %v1538_v12  ;;  %vm1556_vm6 = vweird.f32 %v2839_v17 }
 0xa45   : > { %vm1557_vm11 = vmor %vm1555_vm7, %vm1556_vm6  ;;  %vm2244_vm6 = vcmask 1041409  }
 0xa46   : > { %v1551_v20 = vmul.f32 %v2839_v17, %v1550_v19  ;;  %v1548_v21 = vsel %vm1547_vm5, %v2837_v11, %v1544_v18 }
 0xa47   : > { %v1559_v25 = vmul.f32 %v1548_v21, %v1525_v56 }
 0xa48   : > { %v1552_v22 = vmul.f32 0.5, %v1551_v20 }
 0xa49   : > { %v1564_v29 = vmul.f32 %v2779_v24, %v1559_v25 }
 0xa4a   : > { %v1553_v23 = vsub.f32 1.5, %v1552_v22 }
 0xa4b   : > { %v3361_v32 = vadd.f32 %v2780_v28, %v1564_v29 }
 0xa4c   : > { %v1554_v26 = vmul.f32 %v2839_v17, %v1553_v23 }
 0xa4e   : > { %v1558_v27 = vsel %vm1557_vm11, %v2839_v17, %v1554_v26 }
 0xa4f   : > { %v1560_v30 = vmul.f32 %v1558_v27, %v1526_v63 }
 0xa51   : > { %v1565_v31 = vmul.f32 %v2779_v24, %v1560_v30 }
 0xa53   : > { %v3363_v33 = vadd.f32 %v2780_v28, %v1565_v31 }
 0xa55   : > { %v1576_v34 = vpack.c.bf16 %v3363_v33, %v3361_v32 }
 0xa57   : > { %2621 = vmatmul.msk.bf16.vlgmr.msrb.gmra.mxu3 %vm859_vm0, %v1576_v34 }
 0xada   : > { %v1606_v53 = vpop.f32.mrf.mxu3 }
 0xadb   : > { %v1607_v35 = vadd.f32 %v2781_v49, %v1606_v53 }
 0xae2   : > { %v1608_v58 = vpop.f32.mrf.mxu3 }
 0xae3   : > { %v1609_v36 = vadd.f32 %v2781_v49, %v1608_v58 }
 0xae5   : > { %v3369_v50 = vpack.c.bf16 %v1609_v36, %v1607_v35 }
 0xae7   : > { %1613 = vrot.lane.b32.xlu2 %v3369_v50, %s3610_s1  ;;  %s3617_s1 = smov 104  }
 0xaef   : > { %1685 = vrot.lane.b32.xlu2 %v3369_v50, %s3611_s26  ;;  %s3621_s26 = sshll.u32 %s3109_s24, 4 }
 0xaf7   : > { %1800 = vrot.lane.b32.xlu2 %v3369_v50, %s3612_s5 }
 0xaff   : > { %1895 = vrot.lane.b32.xlu2 %v3369_v50, %s3613_s3 }
 0xb41   : > { %v1614_v37 = vpop.permute.xlu2 %1613 }
 0xb42   : > { %v1619_v38 = vsel %vm963_vm8, %v1614_v37, 0 }
 0xb43   : > { %1628 = vmatpush.bf16.xpose.msra.mxu2 %v1619_v38 }
 0xb49   : > { %v1686_v62 = vpop.permute.xlu2 %1685 }
 0xb4a   : > { %2622 = vmatmul.msk.bf16.vlgmr.msra.gmra.mxu2 %vm963_vm8, %v3369_v50 }
 0xb51   : > { %v1801_v1 = vpop.permute.xlu2 %1800 }
 0xb52   : > { %v1806_v16 = vsel %vm963_vm8, %v1801_v1, 0 }
 0xb59   : > { %v1896_v11 = vpop.permute.xlu2 %1895 }
 0xb5a   : > { %v1901_v13 = vsel %vm963_vm8, %v1896_v11, 0 }
 0xbcd   : > { %v1630_v39 = vpop.f32.mrf.mxu2 }
 0xbce   : > { %v1635_v40 = vmul.f32 0.35355338, %v1630_v39 }
 0xbd0   : > { %v1637_v41 = vadd.f32 %v1635_v40, %v3183_v61 }
 0xbd2   : > { %v1639_v42 = vsel %vm988_vm9, %v1637_v41, -inf }
 0xbd3   : > { %1640 = vmax.xlane.f32.xlu0 %v1639_v42 }
 0xbd5   : > { %v1632_v43 = vpop.f32.mrf.mxu2 }
 0xbd6   : > { %v1636_v44 = vmul.f32 0.35355338, %v1632_v43 }
 0xbd8   : > { %v1638_v45 = vadd.f32 %v1636_v44, %v3190_v2 }
 0xbda   : > { %v1642_v46 = vsel %vm988_vm9, %v1638_v45, -inf }
 0xbdb   : > { %1643 = vmax.xlane.f32.xlu1 %v1642_v46 }
 0xc46   : > { %v1641_v47 = vpop.xlane.xlu0 %1640 }
 0xc47   : > { %v1645_v48 = vsub.f32 %v1637_v41, %v1641_v47 }
 0xc49   : > { %v1647_v51 = vmul.f32 1.442695, %v1645_v48  ;;  %v2886_v48 = vld [vmem:[%s3607_s19] sm:$0xff] }
 0xc4b   : > { %2840 = vpow2.f32 %v1647_v51 }
 0xc4e   : > { %v1644_v52 = vpop.xlane.xlu1 %1643 }
 0xc4f   : > { %v1646_v54 = vsub.f32 %v1638_v45, %v1644_v52 }
 0xc51   : > { %v2841_v55 = vpop.eup %2840  ;;  %v1649_v56 = vmul.f32 1.442695, %v1646_v54 }
 0xc52   : > { %v1651_v59 = vsel %vm988_vm9, %v2841_v55, 0.0 }
 0xc53   : > { %2842 = vpow2.f32 %v1649_v56  ;;  %1652 = vadd.xlane.f32.xlu0 %v1651_v59 }
 0xc59   : > { %v2843_v60 = vpop.eup %2842 }
 0xc5a   : > { %v1654_v57 = vsel %vm988_vm9, %v2843_v60, 0.0 }
 0xc5b   : > { %1655 = vadd.xlane.f32.xlu1 %v1654_v57 }
 0xc67   : > { %1662 = vrot.lane.b32.xlu0 %v3369_v50, %s3614_s30  ;;  %s3447_s30 = scalar_lea.vmem %s3556_s16, %s3621_s26 }
 0xc6f   : > { %1798 = vrot.lane.b32.xlu0 %v3369_v50, %s3615_s25  ;;  %s3618_s25 = smov 56  }
 0xc74   : > { %1687 = vrot.lane.b32.xlu1 %v3369_v50, %s3616_s0  ;;  %s3619_s0 = smov 48  }
 0xc7c   : > { %1893 = vrot.lane.b32.xlu1 %v3369_v50, %s3617_s1  ;;  %s3620_s1 = smov 40  }
 0xcc6   : > { %v1653_v63 = vpop.xlane.xlu0 %1652 }
 0xcce   : > { %v1656_v0 = vpop.xlane.xlu1 %1655 }
 0xccf   : > { %2844 = vrcp.f32 %v1656_v0 }
 0xcd0   : > { %2846 = vrcp.f32 %v1653_v63 }
 0xcd5   : > { %v2845_v3 = vpop.eup %2844 }
 0xcd6   : > { %v2847_v5 = vpop.eup %2846  ;;  %v1660_v6 = vmul.f32 %v2845_v3, %v2843_v60 }
 0xcd7   : > { %v1659_v8 = vmul.f32 %v2847_v5, %v2841_v55 }
 0xcd9   : > { %v1663_v9 = vpop.permute.xlu0 %1662  ;;  %v1661_v12 = vpack.c.bf16 %v1660_v6, %v1659_v8 }
 0xcda   : > { %1675 = vmatpush.bf16.msra.mxu0 %v1663_v9 }
 0xcdd   : > { %2623 = vmatmul.msk.bf16.vlgmr.msra.gmra.mxu0 %vm988_vm9, %v1661_v12 }
 0xcde   : > { %1791 = vmatpush.bf16.msrb.mxu0 %v1782_v7 }
 0xce1   : > { %v1799_v17 = vpop.permute.xlu0 %1798 }
 0xce2   : > { %1910 = vmatpush.bf16.xpose.msra.mxu0 %v1901_v13 }
 0xce6   : > { %v1688_v14 = vpop.permute.xlu1 %1687 }
 0xce7   : > { %v1693_v15 = vsel %vm963_vm8, %v1688_v14, 0 }
 0xce8   : > { %1702 = vmatpush.bf16.xpose.msra.mxu1 %v1693_v15 }
 0xcee   : > { %v1894_v25 = vpop.permute.xlu1 %1893 }
 0xcef   : > { %2625 = vmatmul.msk.bf16.vlgmr.msra.gmra.mxu1 %vm963_vm8, %v1686_v62  ;;  %v2887_v62 = vld [vmem:[%s3607_s19 + $0x8] sm:$0xff] }
 0xcf0   : > { %1815 = vmatpush.bf16.xpose.msrb.mxu1 %v1806_v16 }
 0xcff   : > { %2630 = vmatmul.msk.bf16.vlgmr.msrb.gmra.mxu1 %vm963_vm8, %v1799_v17 }
 0xd5a   : > { %v1677_v18 = vpop.f32.mrf.mxu0 }
 0xd62   : > { %v1679_v19 = vpop.f32.mrf.mxu0 }
 0xd63   : > { %v1684_v20 = vpack.c.bf16 %v1679_v19, %v1677_v18 }
 0xd65   : > { %2629 = vmatmul.msk.bf16.vlgmr.msrb.gmra.mxu0 %vm963_vm8, %v1684_v20 }
 0xd6c   : > { %v1704_v21 = vpop.f32.mrf.mxu1 }
 0xd6d   : > { %v1709_v22 = vmul.f32 0.35355338, %v1704_v21 }
 0xd6f   : > { %v1711_v23 = vadd.f32 %v1709_v22, %v3183_v61 }
 0xd71   : > { %v1713_v24 = vsel %vm988_vm9, %v1711_v23, -inf }
 0xd72   : > { %1714 = vmax.xlane.f32.xlu0 %v1713_v24 }
 0xd74   : > { %v1706_v26 = vpop.f32.mrf.mxu1 }
 0xd75   : > { %v1710_v27 = vmul.f32 0.35355338, %v1706_v26  ;;  %2634 = vmatmul.msk.bf16.vlgmr.msra.gmra.mxu0 %vm963_vm8, %v1894_v25 }
 0xd77   : > { %v1712_v28 = vadd.f32 %v1710_v27, %v3190_v2 }
 0xd79   : > { %v1716_v29 = vsel %vm988_vm9, %v1712_v28, -inf }
 0xd7a   : > { %1717 = vmax.xlane.f32.xlu2 %v1716_v29 }
 0xd7c   : > { %v1817_v30 = vpop.f32.mrf.mxu1 }
 0xd7d   : > { %v1822_v31 = vmul.f32 0.35355338, %v1817_v30 }
 0xd7f   : > { %v1824_v34 = vadd.f32 %v1822_v31, %v3183_v61 }
 0xd81   : > { %v1826_v53 = vsel %vm988_vm9, %v1824_v34, -inf }
 0xd82   : > { %1827 = vmax.xlane.f32.xlu1 %v1826_v53 }
 0xd84   : > { %v1819_v49 = vpop.f32.mrf.mxu1 }
 0xd85   : > { %v1823_v58 = vmul.f32 0.35355338, %v1819_v49  ;;  %v2719_v49 = vld [vmem:[%s3447_s30 + $0x8] sm:$0xff] }
 0xd87   : > { %v1825_v35 = vadd.f32 %v1823_v58, %v3190_v2  ;;  %v2627_v58 = vld [vmem:[%s3214_s22 + $0x14] sm:$0xf] }
 0xd89   : > { %v1829_v36 = vsel %vm988_vm9, %v1825_v35, -inf }
 0xd8a   : > { %1830 = vmax.xlane.f32.xlu0 %v1829_v36 }
 0xde2   : > { %v3414_v37 = vpop.f32.mrf.mxu0 }
 0xde5   : > { %v1715_v38 = vpop.xlane.xlu0 %1714 }
 0xde6   : > { %v1719_v39 = vsub.f32 %v1711_v23, %v1715_v38 }
 0xde8   : > { %v1721_v40 = vmul.f32 1.442695, %v1719_v39 }
 0xdea   : > { %2848 = vpow2.f32 %v1721_v40  ;;  %v3416_v41 = vpop.f32.mrf.mxu0 }
 0xded   : > { %v1718_v42 = vpop.xlane.xlu2 %1717 }
 0xdee   : > { %v1720_v61 = vsub.f32 %v1712_v28, %v1718_v42 }
 0xdf0   : > { %v2849_v43 = vpop.eup %2848  ;;  %v1723_v45 = vmul.f32 1.442695, %v1720_v61 }
 0xdf1   : > { %v1725_v44 = vsel %vm988_vm9, %v2849_v43, 0.0 }
 0xdf2   : > { %1726 = vadd.xlane.f32.xlu0 %v1725_v44  ;;  %v1912_v46 = vpop.f32.mrf.mxu0  ;;  %2850 = vpow2.f32 %v1723_v45 }
 0xdf3   : > { %v1917_v2 = vmul.f32 0.35355338, %v1912_v46 }
 0xdf5   : > { %v1828_v47 = vpop.xlane.xlu1 %1827  ;;  %v1919_v51 = vadd.f32 %v2886_v48, %v1917_v2  ;;  %v2636_v48 = vld [vmem:[%s3214_s22 + $0x1c] sm:$0xf] }
 0xdf6   : > { %v1832_v52 = vsub.f32 %v1824_v34, %v1828_v47 }
 0xdf7   : > { %v1921_v54 = vsel %vm988_vm9, %v1919_v51, -inf }
 0xdf8   : > { %v1834_v55 = vmul.f32 1.442695, %v1832_v52  ;;  %1922 = vmax.xlane.f32.xlu2 %v1921_v54  ;;  %v2851_v60 = vpop.eup %2850  ;;  %v2632_v52 = vld [vmem:[%s3214_s22 + $0x18] sm:$0xf]  ;;  %s3622_s22 = sld [smem:[#allocation8_spill]] }
 0xdf9   : > { %v1728_v3 = vsel %vm988_vm9, %v2851_v60, 0.0  ;;  %v1875_v54 = vsel %vm1110_vm10, %v2632_v52, 0 }
 0xdfa   : > { %2852 = vpow2.f32 %v1834_v55  ;;  %v1914_v56 = vpop.f32.mrf.mxu0 }
 0xdfb   : > { %v1918_v59 = vmul.f32 0.35355338, %v1914_v56 }
 0xdfd   : > { %v1831_v57 = vpop.xlane.xlu0 %1830  ;;  %v1920_v63 = vadd.f32 %v2887_v62, %v1918_v59 }
 0xdfe   : > { %v1833_v0 = vsub.f32 %v1825_v35, %v1831_v57  ;;  %v1762_v35 = vsel %vm1110_vm10, %v2627_v58, 0 }
 0xdff   : > { %v1924_v1 = vsel %vm988_vm9, %v1920_v63, -inf  ;;  %1771 = vmatpush.bf16.msrb.mxu2 %v1762_v35 }
 0xe00   : > { %v3428_v4 = vpop.eup %2852  ;;  %v1836_v5 = vmul.f32 1.442695, %v1833_v0  ;;  %1925 = vmax.xlane.f32.xlu1 %v1924_v1  ;;  %1729 = vadd.xlane.f32.xlu2 %v1728_v3 }
 0xe01   : > { %v1838_v6 = vsel %vm988_vm9, %v3428_v4, 0.0 }
 0xe02   : > { %2854 = vpow2.f32 %v1836_v5  ;;  %1839 = vadd.xlane.f32.xlu0 %v1838_v6 }
 0xe03   : > { %1884 = vmatpush.bf16.msra.mxu2 %v1875_v54 }
 0xe08   : > { %v2855_v7 = vpop.eup %2854 }
 0xe09   : > { %v1841_v8 = vsel %vm988_vm9, %v2855_v7, 0.0 }
 0xe0a   : > { %1842 = vadd.xlane.f32.xlu2 %v1841_v8 }
 0xe19   : > { %1736 = vrot.lane.b32.xlu1 %v3369_v50, %s3618_s25 }
 0xe65   : > { %v1727_v20 = vpop.xlane.xlu0 %1726 }
 0xe6b   : > { %v1923_v9 = vpop.xlane.xlu2 %1922 }
 0xe6c   : > { %v1927_v11 = vsub.f32 %v1919_v51, %v1923_v9  ;;  %v1970_v51 = vsel %vm1110_vm10, %v2636_v48, 0  ;;  %v2784_v48 = vld [vmem:[%s3292_s23 + $0x1] ss:$0 sm:$0xff]  ;;  %s851_s23 = scalar_lea.vmem %s3557_s17, %s3109_s24 }
 0xe6e   : > { %v1929_v12 = vmul.f32 1.442695, %v1927_v11 }
 0xe70   : > { %2856 = vpow2.f32 %v1929_v12 }
 0xe73   : > { %v1926_v13 = vpop.xlane.xlu1 %1925  ;;  %v1730_v18 = vpop.xlane.xlu2 %1729 }
 0xe74   : > { %v1928_v14 = vsub.f32 %v1920_v63, %v1926_v13 }
 0xe75   : > { %v1840_v28 = vpop.xlane.xlu0 %1839 }
 0xe76   : > { %v2857_v15 = vpop.eup %2856  ;;  %v1931_v16 = vmul.f32 1.442695, %v1928_v14 }
 0xe77   : > { %v1933_v17 = vsel %vm988_vm9, %v2857_v15, 0.0 }
 0xe78   : > { %2858 = vpow2.f32 %v1931_v16  ;;  %1934 = vadd.xlane.f32.xlu0 %v1933_v17 }
 0xe79   : > { %2860 = vrcp.f32 %v1730_v18 }
 0xe7a   : > { %2862 = vrcp.f32 %v1727_v20 }
 0xe7d   : > { %v1843_v29 = vpop.xlane.xlu2 %1842 }
 0xe7e   : > { %v2859_v19 = vpop.eup %2858 }
 0xe7f   : > { %v1936_v21 = vsel %vm988_vm9, %v2859_v19, 0.0  ;;  %v2861_v22 = vpop.eup %2860 }
 0xe80   : > { %1937 = vadd.xlane.f32.xlu2 %v1936_v21  ;;  %v2863_v23 = vpop.eup %2862  ;;  %v1734_v24 = vmul.f32 %v2861_v22, %v2851_v60 }
 0xe81   : > { %v1733_v25 = vmul.f32 %v2863_v23, %v2849_v43 }
 0xe83   : > { %v1735_v27 = vpack.c.bf16 %v1734_v24, %v1733_v25 }
 0xe8b   : > { %v1737_v26 = vpop.permute.xlu1 %1736 }
 0xe8c   : > { %1749 = vmatpush.bf16.msra.mxu3 %v1737_v26  ;;  %1849 = vrot.lane.b32.xlu0 %v3369_v50, %s3619_s0  ;;  %v2713_v26 = vld [vmem:[%s3309_s4 + $0x18] sm:$0xff]  ;;  %s3623_s0 = sld [smem:[#allocation21_spill]] }
 0xe8f   : > { %2626 = vmatmul.msk.bf16.vlgmr.msra.gmra.mxu3 %vm988_vm9, %v1735_v27 }
 0xe98   : > { %1944 = vrot.lane.b32.xlu2 %v3369_v50, %s3620_s1 }
 0xeeb   : > { %v1935_v30 = vpop.xlane.xlu0 %1934 }
 0xeec   : > { %2864 = vrcp.f32 %v1935_v30  ;;  %v2712_v30 = vld [vmem:[%s3309_s4 + $0x10] sm:$0xff] }
 0xeed   : > { %2866 = vrcp.f32 %v1843_v29 }
 0xef2   : > { %v2865_v34 = vpop.eup %2864 }
 0xef3   : > { %v1938_v31 = vpop.xlane.xlu2 %1937  ;;  %v2867_v53 = vpop.eup %2866  ;;  %v1941_v38 = vmul.f32 %v2865_v34, %v2857_v15 }
 0xef4   : > { %2868 = vrcp.f32 %v1938_v31  ;;  %v1847_v42 = vmul.f32 %v2867_v53, %v2855_v7  ;;  %v2782_v7 = vld [vmem:[%s3274_s18 + $0x1] ss:$0 sm:$0xff] }
 0xef5   : > { %2870 = vrcp.f32 %v1840_v28 }
 0xefa   : > { %v2869_v50 = vpop.eup %2868 }
 0xefb   : > { %v2871_v36 = vpop.eup %2870  ;;  %v1942_v39 = vmul.f32 %v2869_v50, %v2859_v19  ;;  %v1945_v40 = vpop.permute.xlu2 %1944 }
 0xefc   : > { %1957 = vmatpush.bf16.msra.mxu1 %v1945_v40  ;;  %v1846_v43 = vmul.f32 %v2871_v36, %v3428_v4 }
 0xefd   : > { %v1943_v61 = vpack.c.bf16 %v1942_v39, %v1941_v38 }
 0xefe   : > { %v1850_v44 = vpop.permute.xlu0 %1849  ;;  %v1848_v45 = vpack.c.bf16 %v1847_v42, %v1846_v43 }
 0xeff   : > { %1862 = vmatpush.bf16.msrb.mxu3 %v1850_v44  ;;  %2635 = vmatmul.msk.bf16.vlgmr.msra.gmra.mxu1 %vm988_vm9, %v1943_v61 }
 0xf00   : > { %2268 = vmatpush.bf16.msrb.mxu1 %v2719_v49 }
 0xf02   : > { %2631 = vmatmul.msk.bf16.vlgmr.msrb.gmra.mxu3 %vm988_vm9, %v1848_v45  ;;  %v2783_v45 = vld [vmem:[%s3286_s21 + $0x1] ss:$0 sm:$0xff]  ;;  %s2908_s21 = scalar_lea.hbm %s3623_s0, 4 }
 0xf03   : > { %1979 = vmatpush.bf16.msra.mxu3 %v1970_v51 }
 0xf12   : > { %v1751_v46 = vpop.f32.mrf.mxu3 }
 0xf1a   : > { %v1753_v2 = vpop.f32.mrf.mxu3 }
 0xf1b   : > { %v1757_v47 = vpack.c.bf16 %v1753_v2, %v1751_v46 }
 0xf1d   : > { %2628 = vmatmul.msk.bf16.vlgmr.msrb.gmra.mxu2 %vm963_vm8, %v1757_v47 }
 0xf1e   : > { %2087 = vmatpush.bf16.msrb.mxu2 %v2713_v26 }
 0xf22   : > { %2088 = vmatpush.bf16.msrb.mxu2 %v2712_v30 }
 0xf7c   : > { %v1959_v55 = vpop.f32.mrf.mxu1 }
 0xf84   : > { %v1961_v56 = vpop.f32.mrf.mxu1 }
 0xf85   : > { %v1965_v59 = vpack.c.bf16 %v1961_v56, %v1959_v55  ;;  %v1864_v60 = vpop.f32.mrf.mxu3 }
 0xf87   : > { %2637 = vmatmul.msk.bf16.vlgmr.msra.gmra.mxu3 %vm963_vm8, %v1965_v59 }
 0xf8d   : > { %v1866_v57 = vpop.f32.mrf.mxu3 }
 0xf8e   : > { %v1870_v62 = vpack.c.bf16 %v1866_v57, %v1864_v60  ;;  %v2717_v60 = vld [vmem:[%s3328_s6 + $0x38] sm:$0xff]  ;;  %v2716_v57 = vld [vmem:[%s3328_s6 + $0x30] sm:$0xff] }
 0xf8f   : > { %2159 = vmatpush.bf16.msrb.mxu0 %v2717_v60 }
 0xf90   : > { %2633 = vmatmul.msk.bf16.vlgmr.msra.gmra.mxu2 %vm963_vm8, %v1870_v62  ;;  %v2715_v62 = vld [vmem:[%s3328_s6 + $0x28] sm:$0xff] }
 0xf93   : > { %2160 = vmatpush.bf16.msrb.mxu0 %v2716_v57  ;;  %v2787_v57 = vld [vmem:[%s3342_s2 + $0x1] ss:$0 sm:$0xff] }
 0xf97   : > { %2161 = vmatpush.bf16.msrb.mxu0 %v2715_v62 }
 0xfa0   : > { %v1773_v63 = vpop.f32.mrf.mxu2 }
 0xfa1   : > { %v1794_v1 = vadd.f32 %v3414_v37, %v1773_v63  ;;  %v2714_v63 = vld [vmem:[%s3328_s6 + $0x20] sm:$0xff] }
 0xfa2   : > { %2162 = vmatpush.bf16.msrb.mxu0 %v2714_v63 }
 0xfa8   : > { %v1775_v0 = vpop.f32.mrf.mxu2 }
 0xfa9   : > { %v1796_v9 = vadd.f32 %v3416_v41, %v1775_v0  ;;  %v2785_v0 = vld [vmem:[%s3303_s27 + $0x1] ss:$0 sm:$0xff] }
0x100a   : > { %v1981_v3 = vpop.f32.mrf.mxu3 }
0x1012   : > { %v1983_v15 = vpop.f32.mrf.mxu3 }
0x1013   : > { %v1886_v4 = vpop.f32.mrf.mxu2 }
0x1014   : > { %v1891_v5 = vadd.f32 %v1886_v4, %v1794_v1 }
0x1016   : > { %v1986_v6 = vadd.f32 %v1981_v3, %v1891_v5 }
0x1018   : > { %v1988_v8 = vadd.f32 %v1986_v6, %v3361_v32 }
0x101a   : > { %v1995_v11 = vadd.f32 %v2782_v7, %v1988_v8 }
0x101b   : > { %v1888_v12 = vpop.f32.mrf.mxu2 }
0x101c   : > { %v1892_v13 = vadd.f32 %v1888_v12, %v1796_v9  ;;  %v2001_v14 = vsel %vm859_vm0, %v1995_v11, 0.0 }
0x101d   : > { %2002 = vadd.xlane.f32.xlu1 %v2001_v14 }
0x101e   : > { %v1987_v16 = vadd.f32 %v1983_v15, %v1892_v13 }
0x1020   : > { %v1989_v17 = vadd.f32 %v1987_v16, %v3363_v33 }
0x1022   : > { %v1996_v37 = vadd.f32 %v2782_v7, %v1989_v17 }
0x1024   : > { %v2004_v18 = vsel %vm859_vm0, %v1996_v37, 0.0 }
0x1025   : > { %2005 = vadd.xlane.f32.xlu0 %v2004_v18 }
0x1090   : > { %v2003_v19 = vpop.xlane.xlu1 %2002 }
0x1091   : > { %v2007_v32 = vmul.f32 %v2003_v19, %v3119_v10 }
0x1093   : > { %v2009_v41 = vsub.f32 %v1995_v11, %v2007_v32 }
0x1095   : > { %v2011_v20 = vmul.f32 %v2009_v41, %v2009_v41 }
0x1097   : > { %v2013_v21 = vsel %vm859_vm0, %v2011_v20, 0.0 }
0x1098   : > { %2014 = vadd.xlane.f32.xlu2 %v2013_v21  ;;  %v2006_v22 = vpop.xlane.xlu0 %2005 }
0x1099   : > { %v2008_v23 = vmul.f32 %v2006_v22, %v3119_v10 }
0x109b   : > { %v2010_v24 = vsub.f32 %v1996_v37, %v2008_v23  ;;  %v2786_v23 = vld [vmem:[%s3322_s29 + $0x1] ss:$0 sm:$0xff]  ;;  %s2693_s29 = sshll.u32 %s3622_s22, 1 }
0x109c   : > { %s2289_s1 = scalar_lea.hbm %s3623_s0, %s2693_s29 }
0x109d   : > { %v2012_v25 = vmul.f32 %v2010_v24, %v2010_v24 }
0x109f   : > { %v2016_v33 = vsel %vm859_vm0, %v2012_v25, 0.0 }
0x10a0   : > { %2017 = vadd.xlane.f32.xlu1 %v2016_v33 }
0x110b   : > { %v2015_v27 = vpop.xlane.xlu2 %2014 }
0x110c   : > { %v2019_v28 = vmul.f32 %v2015_v27, %v3119_v10 }
0x110e   : > { %v2021_v29 = vadd.f32 1e-12, %v2019_v28 }
0x1110   : > { %2872 = vrsqrt.f32 %v2021_v29  ;;  %vm2029_vm9 = vweird.f32 %v2021_v29 }
0x1113   : > { %v2018_v31 = vpop.xlane.xlu1 %2017 }
0x1114   : > { %v2020_v34 = vmul.f32 %v2018_v31, %v3119_v10 }
0x1116   : > { %v2873_v53 = vpop.eup %2872  ;;  %v2022_v49 = vadd.f32 1e-12, %v2020_v34 }
0x1117   : > { %v2024_v58 = vmul.f32 %v2873_v53, %v2021_v29  ;;  %vm2030_vm8 = vweird.f32 %v2873_v53 }
0x1118   : > { %2874 = vrsqrt.f32 %v2022_v49  ;;  %vm2031_vm10 = vmor %vm2029_vm9, %vm2030_vm8  ;;  %vm2039_vm13 = vweird.f32 %v2022_v49 }
0x1119   : > { %v2025_v50 = vmul.f32 %v2873_v53, %v2024_v58 }
0x111b   : > { %v2026_v35 = vmul.f32 0.5, %v2025_v50 }
0x111d   : > { %v2027_v36 = vsub.f32 1.5, %v2026_v35 }
0x111e   : > { %v2875_v38 = vpop.eup %2874 }
0x111f   : > { %v2028_v39 = vmul.f32 %v2873_v53, %v2027_v36  ;;  %v2034_v40 = vmul.f32 %v2875_v38, %v2022_v49  ;;  %vm2040_vm12 = vweird.f32 %v2875_v38 }
0x1120   : > { %vm2041_vm14 = vmor %vm2039_vm13, %vm2040_vm12 }
0x1121   : > { %v2035_v42 = vmul.f32 %v2875_v38, %v2034_v40  ;;  %v2032_v61 = vsel %vm2031_vm10, %v2873_v53, %v2028_v39 }
0x1122   : > { %v2043_v46 = vmul.f32 %v2032_v61, %v2009_v41 }
0x1123   : > { %v2036_v43 = vmul.f32 0.5, %v2035_v42 }
0x1124   : > { %v2048_v51 = vmul.f32 %v2783_v45, %v2043_v46 }
0x1125   : > { %v2037_v44 = vsub.f32 1.5, %v2036_v43 }
0x1126   : > { %v2053_v55 = vadd.f32 %v2784_v48, %v2048_v51 }
0x1127   : > { %v2038_v2 = vmul.f32 %v2875_v38, %v2037_v44 }
0x1129   : > { %v2042_v47 = vsel %vm2041_vm14, %v2875_v38, %v2038_v2 }
0x112a   : > { %v2044_v52 = vmul.f32 %v2042_v47, %v2010_v24 }
0x112c   : > { %v2049_v54 = vmul.f32 %v2783_v45, %v2044_v52  ;;  %v2718_v45 = vld [vmem:[%s3447_s30] sm:$0xff]  ;;  %s2293_s30 = sshll.u32 %s2289_s1, 4  ;;  %s2294_s30 = int_to_ptr.hbm [resolvable:$true] %s2293_s30 }
0x112d   : > { %2269 = vmatpush.bf16.msrb.mxu1 %v2718_v45  ;;  %s2902_s4 = sshra.s32 %s2294_s30, 4  ;;  %s2903_s4 = int_to_ptr.hbm [resolvable:$true] %s2902_s4 }
0x112e   : > { %v2054_v56 = vadd.f32 %v2784_v48, %v2049_v54  ;;  %s2904_s6 = scalar_lea.hbm %s2903_s4, 2  ;;  %p2909_p0 = scmp.lt.s32.totalorder %s2903_s4, %s3623_s0 }
0x112f   : > { %p2905_p11 = scmp.ne.s32.totalorder %s2903_s4, %s2904_s6  ;;  %p2910_p1 = scmp.lt.s32.totalorder %s2908_s21, %s2904_s6 }
0x1130   : > { %v2060_v59 = vpack.c.bf16 %v2054_v56, %v2053_v55 }
0x1131   : > { %p2906_p12 = pnand %p2905_p11, %p3097_p5  ;;  %p2911_p2 = por %p2910_p1, %p2909_p0 }
0x1132   : > { %2654 = vmatmul.msk.bf16.vlgmr.msrb.gmra.mxu2 %vm859_vm0, %v2060_v59 }
0x1133   : > { %p2907_p13 = pneg %p2906_p12 }
0x1135   : > { %p2912_p3 = pnand %p2911_p2, %p2907_p13 }
0x11b5   : > { %v2090_v1 = vpop.f32.mrf.mxu2 }
0x11b6   : > { %v2091_v3 = vadd.f32 %v2785_v0, %v2090_v1  ;;  %v2788_v1 = vld [vmem:[%s3348_s7 + $0x1] ss:$0 sm:$0xff]  ;;  %s778_s7 = sand.u32 1, %s2942_s28  }
0x11b7   : > { %s2540_s27 = sshll.u32 %s778_s7, 1  ;;  %s2279_s24 = scalar_lea.sflag [#allocation3], %s778_s7 }
0x11b8   : > { %v2097_v4 = vmul.f32 0.044715, %v2091_v3  ;;  %v2095_v19 = vmul.f32 0.5, %v2091_v3  ;;  %s780_s5 = scalar_lea.vmem [#allocation2], %s2540_s27 }
0x11b9   : > { %s2291_s3 = sshll.u32 %s780_s5, 4  ;;  %s2292_s3 = int_to_ptr.vmem [resolvable:$true] %s2291_s3 }
0x11ba   : > { %v2099_v5 = vmul.f32 %v2097_v4, %v2091_v3 }
0x11bc   : > { %v2101_v6 = vmul.f32 %v2099_v5, %v2091_v3 }
0x11bd   : > { %v2092_v7 = vpop.f32.mrf.mxu2 }
0x11be   : > { %v2103_v8 = vadd.f32 %v2101_v6, %v2091_v3  ;;  %v2093_v9 = vadd.f32 %v2785_v0, %v2092_v7 }
0x11c0   : > { %v2098_v11 = vmul.f32 0.044715, %v2093_v9  ;;  %v2105_v12 = vmul.f32 0.7978846, %v2103_v8  ;;  %v2096_v32 = vmul.f32 0.5, %v2093_v9 }
0x11c2   : > { %v2100_v13 = vmul.f32 %v2098_v11, %v2093_v9  ;;  %2876 = vtanh.f32 %v2105_v12 }
0x11c4   : > { %v2102_v14 = vmul.f32 %v2100_v13, %v2093_v9 }
0x11c6   : > { %v2104_v15 = vadd.f32 %v2102_v14, %v2093_v9 }
0x11c8   : > { %v2106_v16 = vmul.f32 0.7978846, %v2104_v15  ;;  %v2877_v17 = vpop.eup %2876 }
0x11c9   : > { %v2109_v37 = vadd.f32 1.0, %v2877_v17  ;;  %v2789_v17 = vld [vmem:[%s851_s23] ss:$0 sm:$0xff] }
0x11ca   : > { %2878 = vtanh.f32 %v2106_v16 }
0x11cb   : > { %v2111_v20 = vmul.f32 %v2109_v37, %v2095_v19 }
0x11d0   : > { %v2879_v18 = vpop.eup %2878 }
0x11d1   : > { %v2110_v41 = vadd.f32 1.0, %v2879_v18 }
0x11d3   : > { %v2112_v21 = vmul.f32 %v2110_v41, %v2096_v32 }
0x11d5   : > { %v2122_v22 = vpack.c.bf16 %v2112_v21, %v2111_v20 }
0x11d7   : > { %2680 = vmatmul.msk.bf16.vlgmr.msrb.gmra.mxu0 %vm1495_vm2, %v2122_v22 }
0x1254   : > { %v2164_v24 = vpop.f32.mrf.mxu0 }
0x1255   : > { %v2165_v25 = vadd.f32 %v2786_v23, %v2164_v24 }
0x1257   : > { %v2169_v33 = vadd.f32 %v2165_v25, %v2053_v55 }
0x1259   : > { %v2175_v26 = vsel %vm859_vm0, %v2169_v33, 0.0 }
0x125a   : > { %2176 = vadd.xlane.f32.xlu0 %v2175_v26 }
0x125c   : > { %v2166_v27 = vpop.f32.mrf.mxu0 }
0x125d   : > { %v2167_v28 = vadd.f32 %v2786_v23, %v2166_v27 }
0x125f   : > { %v2170_v29 = vadd.f32 %v2167_v28, %v2054_v56 }
0x1261   : > { %v2178_v30 = vsel %vm859_vm0, %v2170_v29, 0.0 }
0x1262   : > { %2179 = vadd.xlane.f32.xlu1 %v2178_v30 }
0x12cd   : > { %v2177_v31 = vpop.xlane.xlu0 %2176 }
0x12ce   : > { %v2181_v34 = vmul.f32 %v2177_v31, %v3119_v10 }
0x12d0   : > { %v2183_v53 = vsub.f32 %v2169_v33, %v2181_v34 }
0x12d2   : > { %v2185_v49 = vmul.f32 %v2183_v53, %v2183_v53 }
0x12d4   : > { %v2187_v58 = vsel %vm859_vm0, %v2185_v49, 0.0 }
0x12d5   : > { %v2180_v50 = vpop.xlane.xlu1 %2179  ;;  %2188 = vadd.xlane.f32.xlu2 %v2187_v58 }
0x12d6   : > { %v2182_v35 = vmul.f32 %v2180_v50, %v3119_v10 }
0x12d8   : > { %v2184_v36 = vsub.f32 %v2170_v29, %v2182_v35 }
0x12da   : > { %v2186_v38 = vmul.f32 %v2184_v36, %v2184_v36 }
0x12dc   : > { %v2190_v39 = vsel %vm859_vm0, %v2186_v38, 0.0 }
0x12dd   : > { %2191 = vadd.xlane.f32.xlu1 %v2190_v39 }
0x1348   : > { %v2189_v40 = vpop.xlane.xlu2 %2188 }
0x1349   : > { %v2193_v42 = vmul.f32 %v2189_v40, %v3119_v10 }
0x134b   : > { %v2195_v61 = vadd.f32 1e-12, %v2193_v42 }
0x134d   : > { %2880 = vrsqrt.f32 %v2195_v61  ;;  %vm2203_vm1 = vweird.f32 %v2195_v61 }
0x1350   : > { %v2192_v43 = vpop.xlane.xlu1 %2191 }
0x1351   : > { %v2194_v44 = vmul.f32 %v2192_v43, %v3119_v10 }
0x1353   : > { %v2881_v46 = vpop.eup %2880  ;;  %v2196_v2 = vadd.f32 1e-12, %v2194_v44 }
0x1354   : > { %v2198_v47 = vmul.f32 %v2881_v46, %v2195_v61  ;;  %vm2204_vm15 = vweird.f32 %v2881_v46 }
0x1355   : > { %2882 = vrsqrt.f32 %v2196_v2  ;;  %vm2205_vm2 = vmor %vm2203_vm1, %vm2204_vm15  ;;  %vm2213_vm4 = vweird.f32 %v2196_v2 }
0x1356   : > { %v2199_v48 = vmul.f32 %v2881_v46, %v2198_v47 }
0x1358   : > { %v2200_v51 = vmul.f32 0.5, %v2199_v48 }
0x135a   : > { %v2201_v52 = vsub.f32 1.5, %v2200_v51 }
0x135b   : > { %v2883_v54 = vpop.eup %2882 }
0x135c   : > { %v2202_v55 = vmul.f32 %v2881_v46, %v2201_v52  ;;  %v2208_v56 = vmul.f32 %v2883_v54, %v2196_v2  ;;  %vm2214_vm3 = vweird.f32 %v2883_v54 }
0x135d   : > { %vm2215_vm5 = vmor %vm2213_vm4, %vm2214_vm3 }
0x135e   : > { %v2206_v59 = vsel %vm2205_vm2, %v2881_v46, %v2202_v55  ;;  %v2209_v60 = vmul.f32 %v2883_v54, %v2208_v56 }
0x135f   : > { %v2217_v62 = vmul.f32 %v2206_v59, %v2183_v53 }
0x1360   : > { %v2210_v10 = vmul.f32 0.5, %v2209_v60 }
0x1361   : > { %v2222_v3 = vmul.f32 %v2787_v57, %v2217_v62 }
0x1362   : > { %v2211_v63 = vsub.f32 1.5, %v2210_v10 }
0x1363   : > { %v2227_v6 = vadd.f32 %v2788_v1, %v2222_v3 }
0x1364   : > { %v2212_v0 = vmul.f32 %v2883_v54, %v2211_v63 }
0x1365   : > { %v2233_v9 = vpack.c.bf16 %v2227_v6, %v2227_v6 }
0x1366   : > { %v2216_v4 = vsel %vm2215_vm5, %v2883_v54, %v2212_v0 }
0x1367   : > { %v2218_v5 = vmul.f32 %v2216_v4, %v2184_v36  ;;  %v2241_v13 = vunpack.c.l.b16 %v2233_v9 }
0x1369   : > { %v2223_v7 = vmul.f32 %v2787_v57, %v2218_v5 }
0x136b   : > { %v2228_v8 = vadd.f32 %v2788_v1, %v2223_v7 }
0x136d   : > { %v2234_v11 = vpack.c.bf16 %v2228_v8, %v2228_v8 }
0x136f   : > { %v2242_v12 = vunpack.c.l.b16 %v2234_v11 }
0x1371   : > { %v2243_v14 = vrot.slane %v2242_v12, 7 }
0x1373   : > { %v2245_v15 = vsel %vm2244_vm6, %v2243_v14, %v2241_v13 }
0x1374   : > { %v2246_v16 = vpack.c.b16 %v2245_v15, %v2245_v15 }
0x1376   : > { %2691 = vmatmul.msk.bf16.vlgmr.msrb.gmra.mxu1 %vm859_vm0, %v2246_v16  ;;  %vm2276_vm0 = vcmask 254976  }
0x13f3   : > { %v2271_v37 = vpop.f32.mrf.mxu1 }
0x13f4   : > { %v2272_v18 = vadd.f32 %v2789_v17, %v2271_v37 }
0x13f6   : > { %2884 = vtanh.f32 %v2272_v18 }
0x13fb   : > { %v2273_v19 = vpop.f32.mrf.mxu1 }
0x13fc   : > { %v2885_v32 = vpop.eup %2884 }
0x13fd   : > { %2277 = vst.msk [vmem:[%s780_s5] sm:$0x3] %vm2276_vm0, %v2885_v32 }
0x13fe   : > { %2915 = shalt.err (!%p2912_p3)
}
0x13ff   : > { %2720 = dma.vmem_to_hbm [thread:$0]  (%p3097_p5), %s2292_s3, 32, %s2294_s30, %s2279_s24  }
0x1400 PF: > { %s3625_s7 = sld [smem:[#allocation7_spill]] }
0x1401   : > { %s3626_s29 = sld [smem:[#allocation5_spill]] }
0x1406   : > { %p2726_p4 = scmp.ge.s32.totalorder %s3625_s7, 2 }
0x1407   : > { %s2305_s25 = sand.u32 1, %s3626_s29  }
0x1408   : > { %p2723_p7 = pnand %p2726_p4, %p3101_p6  ;;  %s2306_s1 = scalar_lea.sflag [#allocation3], %s2305_s25 }
0x140a   : > { %p2724_p8 = pneg %p2723_p7 }
0x140c   : > { %2933 = dma.done.wait (%p2724_p8), %s2306_s1, 32  }
0x140d   : > { %2935 = vsyncadd (%p2724_p8), %s2306_s1, 4294967264  ;;  %s3628_s30 = sld [smem:[#allocation9_spill]]  ;;  %s3631_s27 = smov %s2942_s28 }
0x140e   : > { %s3629_s5 = sld [smem:[#allocation6_spill]] }
0x140f   : > { %s3630_s29 = sld [smem:[#allocation10_spill]] }
0x1413   : > { %p28_p9 = scmp.ge.s32.totalorder %s3628_s30, 4  }
0x1414   : > { %s3632_s28 = smov %s3629_s5 }
0x1415   :  { %30 = sbr.rel (!%p28_p9) target bundleno = 13 (0xd), region = 187 }
0x141a   :  { %2312 = vsyncpa [#allocation3], 1 }
0x141b   :  { %2314 = vsyncpa [#allocation3 + $0x1], 1 }

</bundles_post_ra>
